<compile_context>
chip_gen: v6e
topology: v6e:2x2x1
jax: 0.10.0
libtpu: 0.0.40
codegen_flags: <defaults>
</compile_context>

<pallas_src>
import functools

import jax
import jax.numpy as jnp
from jax.experimental import pallas as pl
from jax.experimental.pallas import tpu as pltpu


# ----------------------------------------------------------------------------
# Fused kernel: all LSTM layers (pair-wavefronted) + output head, single invocation.
#
# ref layout (built dynamically; L layers = n_pairs pairs + optional trailing single layer):
#   inputs : x2                                  (T*Bp, Din)   f32
#            per pair  : w_ih_a (Din_a,4H), b_a (1,4H), w_arow (H,8H)=[W_hh_a|W_ih_b],
#                        w_hh_b (H,4H), b_b (1,4H)
#            per tail  : w_ih (Din,4H), b (1,4H), w_hh (H,4H)
#            w_out_pad (H,128) f32, b_out_pad (1,128) f32
#   output : out (Bp, 128) f32 (real result in lane 0)
#   scratch: pre_sc  (T*Bp, 4H) f32   hoisted input-projection gates (reused per pair)
#            hseq_sc (T*Bp,  H) f32   inter-layer hidden sequence (only when L > 2)
# All gate columns are ordered [i, f, o, g] with i/f/o weights & bias pre-scaled by 0.5.
# ----------------------------------------------------------------------------
def _fused_lstm_kernel(num_layers, seq_len, b_pad, hidden, *refs):
    H = hidden
    H3 = 3 * H
    H4 = 4 * H
    f32 = jnp.float32

    n_pairs = num_layers // 2
    has_tail = (num_layers % 2) == 1
    use_hseq = num_layers > 2

    x_ref = refs[0]
    idx = 1
    pair_refs = []
    for _ in range(n_pairs):
        pair_refs.append(refs[idx:idx + 5])
        idx += 5
    tail_refs = None
    if has_tail:
        tail_refs = refs[idx:idx + 3]
        idx += 3
    w_out_ref = refs[idx]
    b_out_ref = refs[idx + 1]
    out_ref = refs[idx + 2]
    pre_sc = refs[idx + 3]
    hseq_sc = refs[idx + 4] if use_hseq else None

    unroll_cfg = True if seq_len <= 16 else 8  # cap unroll when T grows
    zeros_h = jnp.zeros((b_pad, H), f32)

    def cell(gates, c):
        # gates columns are [i, f, o, g]; i/f/o were pre-scaled by 0.5 in the weights,
        # so sigmoid(x) == 0.5*tanh(gate) + 0.5  ->  ONE EUP tanh pass over the 4H slab.
        t = jnp.tanh(gates)
        sig = t[:, :H3] * f32(0.5) + f32(0.5)
        i = sig[:, :H]
        f = sig[:, H:2 * H]
        o = sig[:, 2 * H:H3]
        g = t[:, H3:]
        c_new = f * c + i * g
        h_new = o * jnp.tanh(c_new)
        return h_new, c_new

    def hoist_proj(w_ih_ref, b_ref, first_layer):
        # whole-sequence input projection: ONE well-shaped matmul, bias folded in.
        w_ih = w_ih_ref[...]
        src = x_ref[...] if first_layer else hseq_sc[...]
        pre_sc[...] = (
            jnp.dot(src.astype(w_ih.dtype), w_ih, preferred_element_type=f32)
            + b_ref[...]
        )

    def run_pair(p_refs, first_layer, write_hseq):
        w_ih_a_ref, b_a_ref, w_arow_ref, w_hh_b_ref, b_b_ref = p_refs
        hoist_proj(w_ih_a_ref, b_a_ref, first_layer)

        w_arow = w_arow_ref[...]   # (H, 8H) = [W_hh_a | W_ih_b]  (256 MXU cols on v6e/v7x)
        w_hh_b = w_hh_b_ref[...]   # (H, 4H)
        b_b = b_b_ref[...]         # (1, 4H), f32
        wdt = w_arow.dtype

        # wavefront prologue (wall step 0): layer a @ t=0; h_a = c_a = 0 so the gates are
        # exactly the hoisted pre-activations of row 0 — no matmul needed.
        h_a0, c_a0 = cell(pre_sc[pl.ds(0, b_pad), :], zeros_h)
        carry0 = (h_a0.astype(wdt), c_a0, zeros_h.astype(wdt), zeros_h)

        def step(s, carry):
            h_a_w, c_a, h_b_w, c_b = carry
            # layer a @ t=s and layer b @ t=s-1: two independent back-to-back MXU pushes
            res_a = jnp.dot(h_a_w, w_arow, preferred_element_type=f32)   # (Bp, 8H)
            res_b = jnp.dot(h_b_w, w_hh_b, preferred_element_type=f32)   # (Bp, 4H)
            row_a = pl.ds(pl.multiple_of(s * b_pad, b_pad), b_pad)
            gates_a = res_a[:, :H4] + pre_sc[row_a, :]
            gates_b = res_a[:, H4:] + res_b + b_b
            h_a_n, c_a_n = cell(gates_a, c_a)
            h_b_n, c_b_n = cell(gates_b, c_b)
            if write_hseq:
                row_b = pl.ds(pl.multiple_of((s - 1) * b_pad, b_pad), b_pad)
                hseq_sc[row_b, :] = h_b_n
            # carry h already in the weight dtype -> next step's MXU LHS needs no pack op
            return h_a_n.astype(wdt), c_a_n, h_b_n.astype(wdt), c_b_n

        h_a_w, _, h_b_w, c_b = jax.lax.fori_loop(
            1, seq_len, step, carry0, unroll=unroll_cfg)

        # wavefront epilogue (wall step T): layer b @ t=T-1
        res_a = jnp.dot(h_a_w, w_arow, preferred_element_type=f32)
        res_b = jnp.dot(h_b_w, w_hh_b, preferred_element_type=f32)
        gates_b = res_a[:, H4:] + res_b + b_b
        h_b, _ = cell(gates_b, c_b)
        if write_hseq:
            row_b = pl.ds(pl.multiple_of((seq_len - 1) * b_pad, b_pad), b_pad)
            hseq_sc[row_b, :] = h_b
        return h_b  # f32

    def run_single(s_refs, first_layer, write_hseq):
        w_ih_ref, b_ref, w_hh_ref = s_refs
        hoist_proj(w_ih_ref, b_ref, first_layer)
        w_hh = w_hh_ref[...]
        wdt = w_hh.dtype

        def step(t, carry):
            h_w, c = carry
            row = pl.ds(pl.multiple_of(t * b_pad, b_pad), b_pad)
            gates = pre_sc[row, :] + jnp.dot(h_w, w_hh, preferred_element_type=f32)
            h_n, c_n = cell(gates, c)
            if write_hseq:
                hseq_sc[row, :] = h_n
            return h_n.astype(wdt), c_n

        h_w, _ = jax.lax.fori_loop(
            0, seq_len, step, (zeros_h.astype(wdt), zeros_h), unroll=unroll_cfg)
        return h_w.astype(f32)

    # ---- run the stack: wavefronted pairs first, then an optional trailing single layer ----
    h_last = None
    for p in range(n_pairs):
        is_last = (not has_tail) and (p == n_pairs - 1)
        h_last = run_pair(pair_refs[p], first_layer=(p == 0), write_hseq=not is_last)
    if has_tail:
        h_last = run_single(tail_refs, first_layer=(n_pairs == 0), write_hseq=False)

    # ---- output head: Linear(H, 1) -> tanh -> *3.14, lane-dense (Bp, 128) store ----
    y = jnp.dot(h_last, w_out_ref[...], preferred_element_type=f32) + b_out_ref[...]
    out_ref[...] = jnp.tanh(y) * f32(3.14)


# ----------------------------------------------------------------------------
# Public forward: x is (B, T, input_dim) batch-first, returns (B, 1).
# ----------------------------------------------------------------------------
def lstm_model_forward(x, params, weight_dtype=jnp.float32):
    B, T, Din = x.shape
    H = params["w_out"].shape[1]
    L = len(params["layers"])
    Bp = max(8, ((B + 7) // 8) * 8)  # pad batch to a sublane multiple -> unmasked ld/st

    # time-major, batch-padded, flattened to a 2D (T*Bp, Din) slab (no in-kernel reshapes)
    x_tm = jnp.transpose(x, (1, 0, 2)).astype(jnp.float32)       # (T, B, Din)
    x_tm = jnp.pad(x_tm, ((0, 0), (0, Bp - B), (0, 0)))          # (T, Bp, Din)
    x2 = x_tm.reshape(T * Bp, Din)

    def reorder_scale_cols(w_t):
        # columns [i, f, g, o] (PyTorch) -> [0.5*i, 0.5*f, 0.5*o, g]
        # 0.5 fold lets the kernel use sigmoid(x) = 0.5*tanh(0.5*x) + 0.5 with a single tanh pass.
        i_, f_, g_, o_ = (w_t[:, :H], w_t[:, H:2 * H], w_t[:, 2 * H:3 * H], w_t[:, 3 * H:])
        return jnp.concatenate([0.5 * i_, 0.5 * f_, 0.5 * o_, g_], axis=1)

    def prep_layer(layer):
        w_ih_t = reorder_scale_cols(layer["w_ih"].T.astype(jnp.float32))                       # (Din_l, 4H)
        w_hh_t = reorder_scale_cols(layer["w_hh"].T.astype(jnp.float32))                       # (H, 4H)
        b_row = reorder_scale_cols((layer["b_ih"] + layer["b_hh"])[None, :].astype(jnp.float32))  # (1, 4H)
        return w_ih_t, w_hh_t, b_row

    prepped = [prep_layer(l) for l in params["layers"]]

    flat = []
    n_pairs = L // 2
    has_tail = (L % 2) == 1
    for p in range(n_pairs):
        wia, wha, ba = prepped[2 * p]
        wib, whb, bb = prepped[2 * p + 1]
        w_arow = jnp.concatenate([wha, wib], axis=1)              # (H, 8H): [W_hh_a | W_ih_b]
        flat += [wia.astype(weight_dtype), ba,
                 w_arow.astype(weight_dtype),
                 whb.astype(weight_dtype), bb]
    if has_tail:
        wic, whc, bc = prepped[-1]
        flat += [wic.astype(weight_dtype), bc, whc.astype(weight_dtype)]

    # lane-dense head: place the single output column in lane 0 of a 128-wide slab
    w_out_pad = jnp.zeros((H, 128), jnp.float32).at[:, 0].set(params["w_out"][0])
    b_out_pad = jnp.zeros((1, 128), jnp.float32).at[0, 0].set(params["b_out"][0])

    scratch = [pltpu.VMEM((T * Bp, 4 * H), jnp.float32)]          # hoisted pre-gates
    if L > 2:
        scratch.append(pltpu.VMEM((T * Bp, H), jnp.float32))      # inter-pair hidden sequence

    n_in = 1 + len(flat) + 2
    kernel = functools.partial(_fused_lstm_kernel, L, T, Bp, H)
    out = pl.pallas_call(
        kernel,
        out_shape=jax.ShapeDtypeStruct((Bp, 128), jnp.float32),
        in_specs=[pl.BlockSpec(memory_space=pltpu.MemorySpace.VMEM)] * n_in,
        out_specs=pl.BlockSpec(memory_space=pltpu.MemorySpace.VMEM),
        scratch_shapes=scratch,
        # VMEM footprint here is tiny (<0.1 MiB); fits the scoped default on v5e/v6e/v7x.
    )(x2, *flat, w_out_pad, b_out_pad)

    return out[:B, :1]


# ----------------------------------------------------------------------------
# Pure-JAX reference (for correctness check)
# ----------------------------------------------------------------------------
def lstm_model_ref(x, params):
    h_seq = x.astype(jnp.float32)
    B = x.shape[0]
    for layer in params["layers"]:
        W_ih, W_hh = layer["w_ih"], layer["w_hh"]                 # (4H, Din), (4H, H)
        b = layer["b_ih"] + layer["b_hh"]
        H = W_hh.shape[1]

        def step(carry, x_t, W_ih=W_ih, W_hh=W_hh, b=b):
            h, c = carry
            gates = x_t @ W_ih.T + h @ W_hh.T + b
            i, f, g, o = jnp.split(gates, 4, axis=-1)
            i, f, o = jax.nn.sigmoid(i), jax.nn.sigmoid(f), jax.nn.sigmoid(o)
            g = jnp.tanh(g)
            c = f * c + i * g
            h = o * jnp.tanh(c)
            return (h, c), h

        init = (jnp.zeros((B, H), jnp.float32), jnp.zeros((B, H), jnp.float32))
        _, hs = jax.lax.scan(step, init, jnp.transpose(h_seq, (1, 0, 2)))
        h_seq = jnp.transpose(hs, (1, 0, 2))
    y = h_seq[:, -1, :] @ params["w_out"].T + params["b_out"]
    return jnp.tanh(y) * 3.14


# ----------------------------------------------------------------------------
# Deterministic parameter construction (PyTorch nn.LSTM / nn.Linear shapes)
# ----------------------------------------------------------------------------
def init_params(key, input_dim, hidden_dim, num_layers):
    k = 1.0 / jnp.sqrt(hidden_dim)
    layers = []
    for l in range(num_layers):
        din = input_dim if l == 0 else hidden_dim
        key, k1, k2, k3, k4 = jax.random.split(key, 5)
        layers.append({
            "w_ih": jax.random.uniform(k1, (4 * hidden_dim, din), jnp.float32, -k, k),
            "w_hh": jax.random.uniform(k2, (4 * hidden_dim, hidden_dim), jnp.float32, -k, k),
            "b_ih": jax.random.uniform(k3, (4 * hidden_dim,), jnp.float32, -k, k),
            "b_hh": jax.random.uniform(k4, (4 * hidden_dim,), jnp.float32, -k, k),
        })
    key, k5, k6 = jax.random.split(key, 3)
    w_out = jax.random.uniform(k5, (1, hidden_dim), jnp.float32, -k, k)   # nn.Linear(H, 1)
    b_out = jax.random.uniform(k6, (1,), jnp.float32, -k, k)
    return {"layers": layers, "w_out": w_out, "b_out": b_out}


if __name__ == "__main__":
    B, T, INPUT_DIM, HIDDEN, NUM_LAYERS = 2, 8, 8, 32, 2

    root = jax.random.PRNGKey(0)
    kx, kp = jax.random.split(root)
    x = jax.random.normal(kx, (B, T, INPUT_DIM), jnp.float32)
    params = init_params(kp, INPUT_DIM, HIDDEN, NUM_LAYERS)

    y_ref = lstm_model_ref(x, params)

    # f32 weights: tight check — validates the [i,f,o,g] reorder, the 0.5 sigmoid fold and
    # the layer-pair wavefront/fused-RHS path against the plain reference.
    y = lstm_model_forward(x, params, weight_dtype=jnp.float32)
    y = jax.block_until_ready(y)
    assert y.shape == (B, 1), y.shape
    assert jnp.allclose(y, y_ref, atol=2e-3, rtol=2e-3), (y, y_ref)

    # bf16 weights (MXU-native on v6e/v7x) with f32 accumulation: tightened tolerance
    y_bf16 = lstm_model_forward(x, params, weight_dtype=jnp.bfloat16)
    y_bf16 = jax.block_until_ready(y_bf16)
    assert y_bf16.shape == (B, 1), y_bf16.shape
    assert jnp.allclose(y_bf16, y_ref, atol=5e-2, rtol=5e-2), (y_bf16, y_ref)

    print("KERNEL_OK")
</pallas_src>

<mosaic_0001>
module attributes {stable_mosaic.version = 11 : i64} {
  func.func @_fused_lstm_kernel(%arg0: memref<64x8xf32, #tpu.memory_space<vmem>>, %arg1: memref<8x128xf32, #tpu.memory_space<vmem>>, %arg2: memref<1x128xf32, #tpu.memory_space<vmem>>, %arg3: memref<32x256xf32, #tpu.memory_space<vmem>>, %arg4: memref<32x128xf32, #tpu.memory_space<vmem>>, %arg5: memref<1x128xf32, #tpu.memory_space<vmem>>, %arg6: memref<32x128xf32, #tpu.memory_space<vmem>>, %arg7: memref<1x128xf32, #tpu.memory_space<vmem>>, %arg8: memref<8x128xf32, #tpu.memory_space<vmem>>, %arg9: memref<64x128xf32, #tpu.memory_space<vmem>>) attributes {dimension_semantics = [], scalar_prefetch = 0 : i64, scratch_operands = 1 : i64, tpu.core_type = #tpu.core_type<tc>} {
    %cst = arith.constant 0.000000e+00 : f32
    %0 = vector.broadcast %cst : f32 to vector<8x32xf32>
    %c0 = arith.constant 0 : index
    %c0_0 = arith.constant 0 : index
    %1 = vector.load %arg1[%c0, %c0_0] : memref<8x128xf32, #tpu.memory_space<vmem>>, vector<8x128xf32>
    %c0_1 = arith.constant 0 : index
    %c0_2 = arith.constant 0 : index
    %2 = vector.load %arg0[%c0_1, %c0_2] : memref<64x8xf32, #tpu.memory_space<vmem>>, vector<64x8xf32>
    %cst_3 = arith.constant dense<0.000000e+00> : vector<64x128xf32>
    %3 = tpu.matmul %2, %1, %cst_3 {dimension_numbers = #tpu.dot_dimension_numbers<[1], [0], [0], [1], [0, 0, 1, 1], [], []>} : vector<64x8xf32>, vector<8x128xf32>, vector<64x128xf32> -> vector<64x128xf32>
    %c0_4 = arith.constant 0 : index
    %c0_5 = arith.constant 0 : index
    %4 = vector.load %arg2[%c0_4, %c0_5] : memref<1x128xf32, #tpu.memory_space<vmem>>, vector<1x128xf32>
    %5 = vector.broadcast %4 : vector<1x128xf32> to vector<64x128xf32>
    %6 = arith.addf %3, %5 : vector<64x128xf32>
    %c0_6 = arith.constant 0 : index
    %c0_7 = arith.constant 0 : index
    %7 = vector.load %arg9[%c0_6, %c0_7] : memref<64x128xf32, #tpu.memory_space<vmem>>, vector<64x128xf32>
    tpu.vector_store %arg9[%c0_6, %c0_7], %6 {strides = array<i32>} : memref<64x128xf32, #tpu.memory_space<vmem>>, vector<64x128xf32>,
    %c0_8 = arith.constant 0 : index
    %c0_9 = arith.constant 0 : index
    %8 = vector.load %arg3[%c0_8, %c0_9] : memref<32x256xf32, #tpu.memory_space<vmem>>, vector<32x256xf32>
    %c0_10 = arith.constant 0 : index
    %c0_11 = arith.constant 0 : index
    %9 = vector.load %arg4[%c0_10, %c0_11] : memref<32x128xf32, #tpu.memory_space<vmem>>, vector<32x128xf32>
    %c0_12 = arith.constant 0 : index
    %c0_13 = arith.constant 0 : index
    %10 = vector.load %arg5[%c0_12, %c0_13] : memref<1x128xf32, #tpu.memory_space<vmem>>, vector<1x128xf32>
    %c0_14 = arith.constant 0 : index
    %c0_15 = arith.constant 0 : index
    %11 = vector.load %arg9[%c0_14, %c0_15] : memref<64x128xf32, #tpu.memory_space<vmem>>, vector<8x128xf32>
    %12 = math.tanh %11 : vector<8x128xf32>
    %13 = vector.extract_strided_slice %12 {offsets = [0, 0], sizes = [8, 96], strides = [1, 1]} : vector<8x128xf32> to vector<8x96xf32>
    %cst_16 = arith.constant 5.000000e-01 : f32
    %14 = vector.broadcast %cst_16 : f32 to vector<8x96xf32>
    %15 = arith.mulf %13, %14 : vector<8x96xf32>
    %cst_17 = arith.constant 5.000000e-01 : f32
    %16 = vector.broadcast %cst_17 : f32 to vector<8x96xf32>
    %17 = arith.addf %15, %16 : vector<8x96xf32>
    %18 = vector.extract_strided_slice %17 {offsets = [0, 0], sizes = [8, 32], strides = [1, 1]} : vector<8x96xf32> to vector<8x32xf32>
    %19 = vector.extract_strided_slice %17 {offsets = [0, 32], sizes = [8, 32], strides = [1, 1]} : vector<8x96xf32> to vector<8x32xf32>
    %20 = vector.extract_strided_slice %17 {offsets = [0, 64], sizes = [8, 32], strides = [1, 1]} : vector<8x96xf32> to vector<8x32xf32>
    %21 = vector.extract_strided_slice %12 {offsets = [0, 96], sizes = [8, 32], strides = [1, 1]} : vector<8x128xf32> to vector<8x32xf32>
    %22 = arith.mulf %19, %0 : vector<8x32xf32>
    %23 = arith.mulf %18, %21 : vector<8x32xf32>
    %24 = arith.addf %22, %23 : vector<8x32xf32>
    %25 = math.tanh %24 : vector<8x32xf32>
    %26 = arith.mulf %20, %25 : vector<8x32xf32>
    %c1_i32 = arith.constant 1 : i32
    %cst_18 = arith.constant dense<0.000000e+00> : vector<8x256xf32>
    %27 = tpu.matmul %26, %8, %cst_18 {dimension_numbers = #tpu.dot_dimension_numbers<[1], [0], [0], [1], [0, 0, 1, 1], [], []>} : vector<8x32xf32>, vector<32x256xf32>, vector<8x256xf32> -> vector<8x256xf32>
    %cst_19 = arith.constant dense<0.000000e+00> : vector<8x128xf32>
    %28 = tpu.matmul %0, %9, %cst_19 {dimension_numbers = #tpu.dot_dimension_numbers<[1], [0], [0], [1], [0, 0, 1, 1], [], []>} : vector<8x32xf32>, vector<32x128xf32>, vector<8x128xf32> -> vector<8x128xf32>
    %c8_i32 = arith.constant 8 : i32
    %29 = arith.muli %c1_i32, %c8_i32 : i32
    %30 = tpu.assume_multiple %29, 8 : i32
    %31 = vector.extract_strided_slice %27 {offsets = [0, 0], sizes = [8, 128], strides = [1, 1]} : vector<8x256xf32> to vector<8x128xf32>
    %32 = arith.index_cast %30 : i32 to index
    %c0_20 = arith.constant 0 : index
    %33 = vector.load %arg9[%32, %c0_20] : memref<64x128xf32, #tpu.memory_space<vmem>>, vector<8x128xf32>
    %34 = arith.addf %31, %33 : vector<8x128xf32>
    %35 = vector.extract_strided_slice %27 {offsets = [0, 128], sizes = [8, 128], strides = [1, 1]} : vector<8x256xf32> to vector<8x128xf32>
    %36 = arith.addf %35, %28 : vector<8x128xf32>
    %37 = vector.broadcast %10 : vector<1x128xf32> to vector<8x128xf32>
    %38 = arith.addf %36, %37 : vector<8x128xf32>
    %39 = math.tanh %34 : vector<8x128xf32>
    %40 = vector.extract_strided_slice %39 {offsets = [0, 0], sizes = [8, 96], strides = [1, 1]} : vector<8x128xf32> to vector<8x96xf32>
    %cst_21 = arith.constant 5.000000e-01 : f32
    %41 = vector.broadcast %cst_21 : f32 to vector<8x96xf32>
    %42 = arith.mulf %40, %41 : vector<8x96xf32>
    %cst_22 = arith.constant 5.000000e-01 : f32
    %43 = vector.broadcast %cst_22 : f32 to vector<8x96xf32>
    %44 = arith.addf %42, %43 : vector<8x96xf32>
    %45 = vector.extract_strided_slice %44 {offsets = [0, 0], sizes = [8, 32], strides = [1, 1]} : vector<8x96xf32> to vector<8x32xf32>
    %46 = vector.extract_strided_slice %44 {offsets = [0, 32], sizes = [8, 32], strides = [1, 1]} : vector<8x96xf32> to vector<8x32xf32>
    %47 = vector.extract_strided_slice %44 {offsets = [0, 64], sizes = [8, 32], strides = [1, 1]} : vector<8x96xf32> to vector<8x32xf32>
    %48 = vector.extract_strided_slice %39 {offsets = [0, 96], sizes = [8, 32], strides = [1, 1]} : vector<8x128xf32> to vector<8x32xf32>
    %49 = arith.mulf %46, %24 : vector<8x32xf32>
    %50 = arith.mulf %45, %48 : vector<8x32xf32>
    %51 = arith.addf %49, %50 : vector<8x32xf32>
    %52 = math.tanh %51 : vector<8x32xf32>
    %53 = arith.mulf %47, %52 : vector<8x32xf32>
    %54 = math.tanh %38 : vector<8x128xf32>
    %55 = vector.extract_strided_slice %54 {offsets = [0, 0], sizes = [8, 96], strides = [1, 1]} : vector<8x128xf32> to vector<8x96xf32>
    %cst_23 = arith.constant 5.000000e-01 : f32
    %56 = vector.broadcast %cst_23 : f32 to vector<8x96xf32>
    %57 = arith.mulf %55, %56 : vector<8x96xf32>
    %cst_24 = arith.constant 5.000000e-01 : f32
    %58 = vector.broadcast %cst_24 : f32 to vector<8x96xf32>
    %59 = arith.addf %57, %58 : vector<8x96xf32>
    %60 = vector.extract_strided_slice %59 {offsets = [0, 0], sizes = [8, 32], strides = [1, 1]} : vector<8x96xf32> to vector<8x32xf32>
    %61 = vector.extract_strided_slice %59 {offsets = [0, 32], sizes = [8, 32], strides = [1, 1]} : vector<8x96xf32> to vector<8x32xf32>
    %62 = vector.extract_strided_slice %59 {offsets = [0, 64], sizes = [8, 32], strides = [1, 1]} : vector<8x96xf32> to vector<8x32xf32>
    %63 = vector.extract_strided_slice %54 {offsets = [0, 96], sizes = [8, 32], strides = [1, 1]} : vector<8x128xf32> to vector<8x32xf32>
    %64 = arith.mulf %61, %0 : vector<8x32xf32>
    %65 = arith.mulf %60, %63 : vector<8x32xf32>
    %66 = arith.addf %64, %65 : vector<8x32xf32>
    %67 = math.tanh %66 : vector<8x32xf32>
    %68 = arith.mulf %62, %67 : vector<8x32xf32>
    %c2_i32 = arith.constant 2 : i32
    %cst_25 = arith.constant dense<0.000000e+00> : vector<8x256xf32>
    %69 = tpu.matmul %53, %8, %cst_25 {dimension_numbers = #tpu.dot_dimension_numbers<[1], [0], [0], [1], [0, 0, 1, 1], [], []>} : vector<8x32xf32>, vector<32x256xf32>, vector<8x256xf32> -> vector<8x256xf32>
    %cst_26 = arith.constant dense<0.000000e+00> : vector<8x128xf32>
    %70 = tpu.matmul %68, %9, %cst_26 {dimension_numbers = #tpu.dot_dimension_numbers<[1], [0], [0], [1], [0, 0, 1, 1], [], []>} : vector<8x32xf32>, vector<32x128xf32>, vector<8x128xf32> -> vector<8x128xf32>
    %c8_i32_27 = arith.constant 8 : i32
    %71 = arith.muli %c2_i32, %c8_i32_27 : i32
    %72 = tpu.assume_multiple %71, 8 : i32
    %73 = vector.extract_strided_slice %69 {offsets = [0, 0], sizes = [8, 128], strides = [1, 1]} : vector<8x256xf32> to vector<8x128xf32>
    %74 = arith.index_cast %72 : i32 to index
    %c0_28 = arith.constant 0 : index
    %75 = vector.load %arg9[%74, %c0_28] : memref<64x128xf32, #tpu.memory_space<vmem>>, vector<8x128xf32>
    %76 = arith.addf %73, %75 : vector<8x128xf32>
    %77 = vector.extract_strided_slice %69 {offsets = [0, 128], sizes = [8, 128], strides = [1, 1]} : vector<8x256xf32> to vector<8x128xf32>
    %78 = arith.addf %77, %70 : vector<8x128xf32>
    %79 = vector.broadcast %10 : vector<1x128xf32> to vector<8x128xf32>
    %80 = arith.addf %78, %79 : vector<8x128xf32>
    %81 = math.tanh %76 : vector<8x128xf32>
    %82 = vector.extract_strided_slice %81 {offsets = [0, 0], sizes = [8, 96], strides = [1, 1]} : vector<8x128xf32> to vector<8x96xf32>
    %cst_29 = arith.constant 5.000000e-01 : f32
    %83 = vector.broadcast %cst_29 : f32 to vector<8x96xf32>
    %84 = arith.mulf %82, %83 : vector<8x96xf32>
    %cst_30 = arith.constant 5.000000e-01 : f32
    %85 = vector.broadcast %cst_30 : f32 to vector<8x96xf32>
    %86 = arith.addf %84, %85 : vector<8x96xf32>
    %87 = vector.extract_strided_slice %86 {offsets = [0, 0], sizes = [8, 32], strides = [1, 1]} : vector<8x96xf32> to vector<8x32xf32>
    %88 = vector.extract_strided_slice %86 {offsets = [0, 32], sizes = [8, 32], strides = [1, 1]} : vector<8x96xf32> to vector<8x32xf32>
    %89 = vector.extract_strided_slice %86 {offsets = [0, 64], sizes = [8, 32], strides = [1, 1]} : vector<8x96xf32> to vector<8x32xf32>
    %90 = vector.extract_strided_slice %81 {offsets = [0, 96], sizes = [8, 32], strides = [1, 1]} : vector<8x128xf32> to vector<8x32xf32>
    %91 = arith.mulf %88, %51 : vector<8x32xf32>
    %92 = arith.mulf %87, %90 : vector<8x32xf32>
    %93 = arith.addf %91, %92 : vector<8x32xf32>
    %94 = math.tanh %93 : vector<8x32xf32>
    %95 = arith.mulf %89, %94 : vector<8x32xf32>
    %96 = math.tanh %80 : vector<8x128xf32>
    %97 = vector.extract_strided_slice %96 {offsets = [0, 0], sizes = [8, 96], strides = [1, 1]} : vector<8x128xf32> to vector<8x96xf32>
    %cst_31 = arith.constant 5.000000e-01 : f32
    %98 = vector.broadcast %cst_31 : f32 to vector<8x96xf32>
    %99 = arith.mulf %97, %98 : vector<8x96xf32>
    %cst_32 = arith.constant 5.000000e-01 : f32
    %100 = vector.broadcast %cst_32 : f32 to vector<8x96xf32>
    %101 = arith.addf %99, %100 : vector<8x96xf32>
    %102 = vector.extract_strided_slice %101 {offsets = [0, 0], sizes = [8, 32], strides = [1, 1]} : vector<8x96xf32> to vector<8x32xf32>
    %103 = vector.extract_strided_slice %101 {offsets = [0, 32], sizes = [8, 32], strides = [1, 1]} : vector<8x96xf32> to vector<8x32xf32>
    %104 = vector.extract_strided_slice %101 {offsets = [0, 64], sizes = [8, 32], strides = [1, 1]} : vector<8x96xf32> to vector<8x32xf32>
    %105 = vector.extract_strided_slice %96 {offsets = [0, 96], sizes = [8, 32], strides = [1, 1]} : vector<8x128xf32> to vector<8x32xf32>
    %106 = arith.mulf %103, %66 : vector<8x32xf32>
    %107 = arith.mulf %102, %105 : vector<8x32xf32>
    %108 = arith.addf %106, %107 : vector<8x32xf32>
    %109 = math.tanh %108 : vector<8x32xf32>
    %110 = arith.mulf %104, %109 : vector<8x32xf32>
    %c3_i32 = arith.constant 3 : i32
    %cst_33 = arith.constant dense<0.000000e+00> : vector<8x256xf32>
    %111 = tpu.matmul %95, %8, %cst_33 {dimension_numbers = #tpu.dot_dimension_numbers<[1], [0], [0], [1], [0, 0, 1, 1], [], []>} : vector<8x32xf32>, vector<32x256xf32>, vector<8x256xf32> -> vector<8x256xf32>
    %cst_34 = arith.constant dense<0.000000e+00> : vector<8x128xf32>
    %112 = tpu.matmul %110, %9, %cst_34 {dimension_numbers = #tpu.dot_dimension_numbers<[1], [0], [0], [1], [0, 0, 1, 1], [], []>} : vector<8x32xf32>, vector<32x128xf32>, vector<8x128xf32> -> vector<8x128xf32>
    %c8_i32_35 = arith.constant 8 : i32
    %113 = arith.muli %c3_i32, %c8_i32_35 : i32
    %114 = tpu.assume_multiple %113, 8 : i32
    %115 = vector.extract_strided_slice %111 {offsets = [0, 0], sizes = [8, 128], strides = [1, 1]} : vector<8x256xf32> to vector<8x128xf32>
    %116 = arith.index_cast %114 : i32 to index
    %c0_36 = arith.constant 0 : index
    %117 = vector.load %arg9[%116, %c0_36] : memref<64x128xf32, #tpu.memory_space<vmem>>, vector<8x128xf32>
    %118 = arith.addf %115, %117 : vector<8x128xf32>
    %119 = vector.extract_strided_slice %111 {offsets = [0, 128], sizes = [8, 128], strides = [1, 1]} : vector<8x256xf32> to vector<8x128xf32>
    %120 = arith.addf %119, %112 : vector<8x128xf32>
    %121 = vector.broadcast %10 : vector<1x128xf32> to vector<8x128xf32>
    %122 = arith.addf %120, %121 : vector<8x128xf32>
    %123 = math.tanh %118 : vector<8x128xf32>
    %124 = vector.extract_strided_slice %123 {offsets = [0, 0], sizes = [8, 96], strides = [1, 1]} : vector<8x128xf32> to vector<8x96xf32>
    %cst_37 = arith.constant 5.000000e-01 : f32
    %125 = vector.broadcast %cst_37 : f32 to vector<8x96xf32>
    %126 = arith.mulf %124, %125 : vector<8x96xf32>
    %cst_38 = arith.constant 5.000000e-01 : f32
    %127 = vector.broadcast %cst_38 : f32 to vector<8x96xf32>
    %128 = arith.addf %126, %127 : vector<8x96xf32>
    %129 = vector.extract_strided_slice %128 {offsets = [0, 0], sizes = [8, 32], strides = [1, 1]} : vector<8x96xf32> to vector<8x32xf32>
    %130 = vector.extract_strided_slice %128 {offsets = [0, 32], sizes = [8, 32], strides = [1, 1]} : vector<8x96xf32> to vector<8x32xf32>
    %131 = vector.extract_strided_slice %128 {offsets = [0, 64], sizes = [8, 32], strides = [1, 1]} : vector<8x96xf32> to vector<8x32xf32>
    %132 = vector.extract_strided_slice %123 {offsets = [0, 96], sizes = [8, 32], strides = [1, 1]} : vector<8x128xf32> to vector<8x32xf32>
    %133 = arith.mulf %130, %93 : vector<8x32xf32>
    %134 = arith.mulf %129, %132 : vector<8x32xf32>
    %135 = arith.addf %133, %134 : vector<8x32xf32>
    %136 = math.tanh %135 : vector<8x32xf32>
    %137 = arith.mulf %131, %136 : vector<8x32xf32>
    %138 = math.tanh %122 : vector<8x128xf32>
    %139 = vector.extract_strided_slice %138 {offsets = [0, 0], sizes = [8, 96], strides = [1, 1]} : vector<8x128xf32> to vector<8x96xf32>
    %cst_39 = arith.constant 5.000000e-01 : f32
    %140 = vector.broadcast %cst_39 : f32 to vector<8x96xf32>
    %141 = arith.mulf %139, %140 : vector<8x96xf32>
    %cst_40 = arith.constant 5.000000e-01 : f32
    %142 = vector.broadcast %cst_40 : f32 to vector<8x96xf32>
    %143 = arith.addf %141, %142 : vector<8x96xf32>
    %144 = vector.extract_strided_slice %143 {offsets = [0, 0], sizes = [8, 32], strides = [1, 1]} : vector<8x96xf32> to vector<8x32xf32>
    %145 = vector.extract_strided_slice %143 {offsets = [0, 32], sizes = [8, 32], strides = [1, 1]} : vector<8x96xf32> to vector<8x32xf32>
    %146 = vector.extract_strided_slice %143 {offsets = [0, 64], sizes = [8, 32], strides = [1, 1]} : vector<8x96xf32> to vector<8x32xf32>
    %147 = vector.extract_strided_slice %138 {offsets = [0, 96], sizes = [8, 32], strides = [1, 1]} : vector<8x128xf32> to vector<8x32xf32>
    %148 = arith.mulf %145, %108 : vector<8x32xf32>
    %149 = arith.mulf %144, %147 : vector<8x32xf32>
    %150 = arith.addf %148, %149 : vector<8x32xf32>
    %151 = math.tanh %150 : vector<8x32xf32>
    %152 = arith.mulf %146, %151 : vector<8x32xf32>
    %c4_i32 = arith.constant 4 : i32
    %cst_41 = arith.constant dense<0.000000e+00> : vector<8x256xf32>
    %153 = tpu.matmul %137, %8, %cst_41 {dimension_numbers = #tpu.dot_dimension_numbers<[1], [0], [0], [1], [0, 0, 1, 1], [], []>} : vector<8x32xf32>, vector<32x256xf32>, vector<8x256xf32> -> vector<8x256xf32>
    %cst_42 = arith.constant dense<0.000000e+00> : vector<8x128xf32>
    %154 = tpu.matmul %152, %9, %cst_42 {dimension_numbers = #tpu.dot_dimension_numbers<[1], [0], [0], [1], [0, 0, 1, 1], [], []>} : vector<8x32xf32>, vector<32x128xf32>, vector<8x128xf32> -> vector<8x128xf32>
    %c8_i32_43 = arith.constant 8 : i32
    %155 = arith.muli %c4_i32, %c8_i32_43 : i32
    %156 = tpu.assume_multiple %155, 8 : i32
    %157 = vector.extract_strided_slice %153 {offsets = [0, 0], sizes = [8, 128], strides = [1, 1]} : vector<8x256xf32> to vector<8x128xf32>
    %158 = arith.index_cast %156 : i32 to index
    %c0_44 = arith.constant 0 : index
    %159 = vector.load %arg9[%158, %c0_44] : memref<64x128xf32, #tpu.memory_space<vmem>>, vector<8x128xf32>
    %160 = arith.addf %157, %159 : vector<8x128xf32>
    %161 = vector.extract_strided_slice %153 {offsets = [0, 128], sizes = [8, 128], strides = [1, 1]} : vector<8x256xf32> to vector<8x128xf32>
    %162 = arith.addf %161, %154 : vector<8x128xf32>
    %163 = vector.broadcast %10 : vector<1x128xf32> to vector<8x128xf32>
    %164 = arith.addf %162, %163 : vector<8x128xf32>
    %165 = math.tanh %160 : vector<8x128xf32>
    %166 = vector.extract_strided_slice %165 {offsets = [0, 0], sizes = [8, 96], strides = [1, 1]} : vector<8x128xf32> to vector<8x96xf32>
    %cst_45 = arith.constant 5.000000e-01 : f32
    %167 = vector.broadcast %cst_45 : f32 to vector<8x96xf32>
    %168 = arith.mulf %166, %167 : vector<8x96xf32>
    %cst_46 = arith.constant 5.000000e-01 : f32
    %169 = vector.broadcast %cst_46 : f32 to vector<8x96xf32>
    %170 = arith.addf %168, %169 : vector<8x96xf32>
    %171 = vector.extract_strided_slice %170 {offsets = [0, 0], sizes = [8, 32], strides = [1, 1]} : vector<8x96xf32> to vector<8x32xf32>
    %172 = vector.extract_strided_slice %170 {offsets = [0, 32], sizes = [8, 32], strides = [1, 1]} : vector<8x96xf32> to vector<8x32xf32>
    %173 = vector.extract_strided_slice %170 {offsets = [0, 64], sizes = [8, 32], strides = [1, 1]} : vector<8x96xf32> to vector<8x32xf32>
    %174 = vector.extract_strided_slice %165 {offsets = [0, 96], sizes = [8, 32], strides = [1, 1]} : vector<8x128xf32> to vector<8x32xf32>
    %175 = arith.mulf %172, %135 : vector<8x32xf32>
    %176 = arith.mulf %171, %174 : vector<8x32xf32>
    %177 = arith.addf %175, %176 : vector<8x32xf32>
    %178 = math.tanh %177 : vector<8x32xf32>
    %179 = arith.mulf %173, %178 : vector<8x32xf32>
    %180 = math.tanh %164 : vector<8x128xf32>
    %181 = vector.extract_strided_slice %180 {offsets = [0, 0], sizes = [8, 96], strides = [1, 1]} : vector<8x128xf32> to vector<8x96xf32>
    %cst_47 = arith.constant 5.000000e-01 : f32
    %182 = vector.broadcast %cst_47 : f32 to vector<8x96xf32>
    %183 = arith.mulf %181, %182 : vector<8x96xf32>
    %cst_48 = arith.constant 5.000000e-01 : f32
    %184 = vector.broadcast %cst_48 : f32 to vector<8x96xf32>
    %185 = arith.addf %183, %184 : vector<8x96xf32>
    %186 = vector.extract_strided_slice %185 {offsets = [0, 0], sizes = [8, 32], strides = [1, 1]} : vector<8x96xf32> to vector<8x32xf32>
    %187 = vector.extract_strided_slice %185 {offsets = [0, 32], sizes = [8, 32], strides = [1, 1]} : vector<8x96xf32> to vector<8x32xf32>
    %188 = vector.extract_strided_slice %185 {offsets = [0, 64], sizes = [8, 32], strides = [1, 1]} : vector<8x96xf32> to vector<8x32xf32>
    %189 = vector.extract_strided_slice %180 {offsets = [0, 96], sizes = [8, 32], strides = [1, 1]} : vector<8x128xf32> to vector<8x32xf32>
    %190 = arith.mulf %187, %150 : vector<8x32xf32>
    %191 = arith.mulf %186, %189 : vector<8x32xf32>
    %192 = arith.addf %190, %191 : vector<8x32xf32>
    %193 = math.tanh %192 : vector<8x32xf32>
    %194 = arith.mulf %188, %193 : vector<8x32xf32>
    %c5_i32 = arith.constant 5 : i32
    %cst_49 = arith.constant dense<0.000000e+00> : vector<8x256xf32>
    %195 = tpu.matmul %179, %8, %cst_49 {dimension_numbers = #tpu.dot_dimension_numbers<[1], [0], [0], [1], [0, 0, 1, 1], [], []>} : vector<8x32xf32>, vector<32x256xf32>, vector<8x256xf32> -> vector<8x256xf32>
    %cst_50 = arith.constant dense<0.000000e+00> : vector<8x128xf32>
    %196 = tpu.matmul %194, %9, %cst_50 {dimension_numbers = #tpu.dot_dimension_numbers<[1], [0], [0], [1], [0, 0, 1, 1], [], []>} : vector<8x32xf32>, vector<32x128xf32>, vector<8x128xf32> -> vector<8x128xf32>
    %c8_i32_51 = arith.constant 8 : i32
    %197 = arith.muli %c5_i32, %c8_i32_51 : i32
    %198 = tpu.assume_multiple %197, 8 : i32
    %199 = vector.extract_strided_slice %195 {offsets = [0, 0], sizes = [8, 128], strides = [1, 1]} : vector<8x256xf32> to vector<8x128xf32>
    %200 = arith.index_cast %198 : i32 to index
    %c0_52 = arith.constant 0 : index
    %201 = vector.load %arg9[%200, %c0_52] : memref<64x128xf32, #tpu.memory_space<vmem>>, vector<8x128xf32>
    %202 = arith.addf %199, %201 : vector<8x128xf32>
    %203 = vector.extract_strided_slice %195 {offsets = [0, 128], sizes = [8, 128], strides = [1, 1]} : vector<8x256xf32> to vector<8x128xf32>
    %204 = arith.addf %203, %196 : vector<8x128xf32>
    %205 = vector.broadcast %10 : vector<1x128xf32> to vector<8x128xf32>
    %206 = arith.addf %204, %205 : vector<8x128xf32>
    %207 = math.tanh %202 : vector<8x128xf32>
    %208 = vector.extract_strided_slice %207 {offsets = [0, 0], sizes = [8, 96], strides = [1, 1]} : vector<8x128xf32> to vector<8x96xf32>
    %cst_53 = arith.constant 5.000000e-01 : f32
    %209 = vector.broadcast %cst_53 : f32 to vector<8x96xf32>
    %210 = arith.mulf %208, %209 : vector<8x96xf32>
    %cst_54 = arith.constant 5.000000e-01 : f32
    %211 = vector.broadcast %cst_54 : f32 to vector<8x96xf32>
    %212 = arith.addf %210, %211 : vector<8x96xf32>
    %213 = vector.extract_strided_slice %212 {offsets = [0, 0], sizes = [8, 32], strides = [1, 1]} : vector<8x96xf32> to vector<8x32xf32>
    %214 = vector.extract_strided_slice %212 {offsets = [0, 32], sizes = [8, 32], strides = [1, 1]} : vector<8x96xf32> to vector<8x32xf32>
    %215 = vector.extract_strided_slice %212 {offsets = [0, 64], sizes = [8, 32], strides = [1, 1]} : vector<8x96xf32> to vector<8x32xf32>
    %216 = vector.extract_strided_slice %207 {offsets = [0, 96], sizes = [8, 32], strides = [1, 1]} : vector<8x128xf32> to vector<8x32xf32>
    %217 = arith.mulf %214, %177 : vector<8x32xf32>
    %218 = arith.mulf %213, %216 : vector<8x32xf32>
    %219 = arith.addf %217, %218 : vector<8x32xf32>
    %220 = math.tanh %219 : vector<8x32xf32>
    %221 = arith.mulf %215, %220 : vector<8x32xf32>
    %222 = math.tanh %206 : vector<8x128xf32>
    %223 = vector.extract_strided_slice %222 {offsets = [0, 0], sizes = [8, 96], strides = [1, 1]} : vector<8x128xf32> to vector<8x96xf32>
    %cst_55 = arith.constant 5.000000e-01 : f32
    %224 = vector.broadcast %cst_55 : f32 to vector<8x96xf32>
    %225 = arith.mulf %223, %224 : vector<8x96xf32>
    %cst_56 = arith.constant 5.000000e-01 : f32
    %226 = vector.broadcast %cst_56 : f32 to vector<8x96xf32>
    %227 = arith.addf %225, %226 : vector<8x96xf32>
    %228 = vector.extract_strided_slice %227 {offsets = [0, 0], sizes = [8, 32], strides = [1, 1]} : vector<8x96xf32> to vector<8x32xf32>
    %229 = vector.extract_strided_slice %227 {offsets = [0, 32], sizes = [8, 32], strides = [1, 1]} : vector<8x96xf32> to vector<8x32xf32>
    %230 = vector.extract_strided_slice %227 {offsets = [0, 64], sizes = [8, 32], strides = [1, 1]} : vector<8x96xf32> to vector<8x32xf32>
    %231 = vector.extract_strided_slice %222 {offsets = [0, 96], sizes = [8, 32], strides = [1, 1]} : vector<8x128xf32> to vector<8x32xf32>
    %232 = arith.mulf %229, %192 : vector<8x32xf32>
    %233 = arith.mulf %228, %231 : vector<8x32xf32>
    %234 = arith.addf %232, %233 : vector<8x32xf32>
    %235 = math.tanh %234 : vector<8x32xf32>
    %236 = arith.mulf %230, %235 : vector<8x32xf32>
    %c6_i32 = arith.constant 6 : i32
    %cst_57 = arith.constant dense<0.000000e+00> : vector<8x256xf32>
    %237 = tpu.matmul %221, %8, %cst_57 {dimension_numbers = #tpu.dot_dimension_numbers<[1], [0], [0], [1], [0, 0, 1, 1], [], []>} : vector<8x32xf32>, vector<32x256xf32>, vector<8x256xf32> -> vector<8x256xf32>
    %cst_58 = arith.constant dense<0.000000e+00> : vector<8x128xf32>
    %238 = tpu.matmul %236, %9, %cst_58 {dimension_numbers = #tpu.dot_dimension_numbers<[1], [0], [0], [1], [0, 0, 1, 1], [], []>} : vector<8x32xf32>, vector<32x128xf32>, vector<8x128xf32> -> vector<8x128xf32>
    %c8_i32_59 = arith.constant 8 : i32
    %239 = arith.muli %c6_i32, %c8_i32_59 : i32
    %240 = tpu.assume_multiple %239, 8 : i32
    %241 = vector.extract_strided_slice %237 {offsets = [0, 0], sizes = [8, 128], strides = [1, 1]} : vector<8x256xf32> to vector<8x128xf32>
    %242 = arith.index_cast %240 : i32 to index
    %c0_60 = arith.constant 0 : index
    %243 = vector.load %arg9[%242, %c0_60] : memref<64x128xf32, #tpu.memory_space<vmem>>, vector<8x128xf32>
    %244 = arith.addf %241, %243 : vector<8x128xf32>
    %245 = vector.extract_strided_slice %237 {offsets = [0, 128], sizes = [8, 128], strides = [1, 1]} : vector<8x256xf32> to vector<8x128xf32>
    %246 = arith.addf %245, %238 : vector<8x128xf32>
    %247 = vector.broadcast %10 : vector<1x128xf32> to vector<8x128xf32>
    %248 = arith.addf %246, %247 : vector<8x128xf32>
    %249 = math.tanh %244 : vector<8x128xf32>
    %250 = vector.extract_strided_slice %249 {offsets = [0, 0], sizes = [8, 96], strides = [1, 1]} : vector<8x128xf32> to vector<8x96xf32>
    %cst_61 = arith.constant 5.000000e-01 : f32
    %251 = vector.broadcast %cst_61 : f32 to vector<8x96xf32>
    %252 = arith.mulf %250, %251 : vector<8x96xf32>
    %cst_62 = arith.constant 5.000000e-01 : f32
    %253 = vector.broadcast %cst_62 : f32 to vector<8x96xf32>
    %254 = arith.addf %252, %253 : vector<8x96xf32>
    %255 = vector.extract_strided_slice %254 {offsets = [0, 0], sizes = [8, 32], strides = [1, 1]} : vector<8x96xf32> to vector<8x32xf32>
    %256 = vector.extract_strided_slice %254 {offsets = [0, 32], sizes = [8, 32], strides = [1, 1]} : vector<8x96xf32> to vector<8x32xf32>
    %257 = vector.extract_strided_slice %254 {offsets = [0, 64], sizes = [8, 32], strides = [1, 1]} : vector<8x96xf32> to vector<8x32xf32>
    %258 = vector.extract_strided_slice %249 {offsets = [0, 96], sizes = [8, 32], strides = [1, 1]} : vector<8x128xf32> to vector<8x32xf32>
    %259 = arith.mulf %256, %219 : vector<8x32xf32>
    %260 = arith.mulf %255, %258 : vector<8x32xf32>
    %261 = arith.addf %259, %260 : vector<8x32xf32>
    %262 = math.tanh %261 : vector<8x32xf32>
    %263 = arith.mulf %257, %262 : vector<8x32xf32>
    %264 = math.tanh %248 : vector<8x128xf32>
    %265 = vector.extract_strided_slice %264 {offsets = [0, 0], sizes = [8, 96], strides = [1, 1]} : vector<8x128xf32> to vector<8x96xf32>
    %cst_63 = arith.constant 5.000000e-01 : f32
    %266 = vector.broadcast %cst_63 : f32 to vector<8x96xf32>
    %267 = arith.mulf %265, %266 : vector<8x96xf32>
    %cst_64 = arith.constant 5.000000e-01 : f32
    %268 = vector.broadcast %cst_64 : f32 to vector<8x96xf32>
    %269 = arith.addf %267, %268 : vector<8x96xf32>
    %270 = vector.extract_strided_slice %269 {offsets = [0, 0], sizes = [8, 32], strides = [1, 1]} : vector<8x96xf32> to vector<8x32xf32>
    %271 = vector.extract_strided_slice %269 {offsets = [0, 32], sizes = [8, 32], strides = [1, 1]} : vector<8x96xf32> to vector<8x32xf32>
    %272 = vector.extract_strided_slice %269 {offsets = [0, 64], sizes = [8, 32], strides = [1, 1]} : vector<8x96xf32> to vector<8x32xf32>
    %273 = vector.extract_strided_slice %264 {offsets = [0, 96], sizes = [8, 32], strides = [1, 1]} : vector<8x128xf32> to vector<8x32xf32>
    %274 = arith.mulf %271, %234 : vector<8x32xf32>
    %275 = arith.mulf %270, %273 : vector<8x32xf32>
    %276 = arith.addf %274, %275 : vector<8x32xf32>
    %277 = math.tanh %276 : vector<8x32xf32>
    %278 = arith.mulf %272, %277 : vector<8x32xf32>
    %c7_i32 = arith.constant 7 : i32
    %cst_65 = arith.constant dense<0.000000e+00> : vector<8x256xf32>
    %279 = tpu.matmul %263, %8, %cst_65 {dimension_numbers = #tpu.dot_dimension_numbers<[1], [0], [0], [1], [0, 0, 1, 1], [], []>} : vector<8x32xf32>, vector<32x256xf32>, vector<8x256xf32> -> vector<8x256xf32>
    %cst_66 = arith.constant dense<0.000000e+00> : vector<8x128xf32>
    %280 = tpu.matmul %278, %9, %cst_66 {dimension_numbers = #tpu.dot_dimension_numbers<[1], [0], [0], [1], [0, 0, 1, 1], [], []>} : vector<8x32xf32>, vector<32x128xf32>, vector<8x128xf32> -> vector<8x128xf32>
    %c8_i32_67 = arith.constant 8 : i32
    %281 = arith.muli %c7_i32, %c8_i32_67 : i32
    %282 = tpu.assume_multiple %281, 8 : i32
    %283 = vector.extract_strided_slice %279 {offsets = [0, 0], sizes = [8, 128], strides = [1, 1]} : vector<8x256xf32> to vector<8x128xf32>
    %284 = arith.index_cast %282 : i32 to index
    %c0_68 = arith.constant 0 : index
    %285 = vector.load %arg9[%284, %c0_68] : memref<64x128xf32, #tpu.memory_space<vmem>>, vector<8x128xf32>
    %286 = arith.addf %283, %285 : vector<8x128xf32>
    %287 = vector.extract_strided_slice %279 {offsets = [0, 128], sizes = [8, 128], strides = [1, 1]} : vector<8x256xf32> to vector<8x128xf32>
    %288 = arith.addf %287, %280 : vector<8x128xf32>
    %289 = vector.broadcast %10 : vector<1x128xf32> to vector<8x128xf32>
    %290 = arith.addf %288, %289 : vector<8x128xf32>
    %291 = math.tanh %286 : vector<8x128xf32>
    %292 = vector.extract_strided_slice %291 {offsets = [0, 0], sizes = [8, 96], strides = [1, 1]} : vector<8x128xf32> to vector<8x96xf32>
    %cst_69 = arith.constant 5.000000e-01 : f32
    %293 = vector.broadcast %cst_69 : f32 to vector<8x96xf32>
    %294 = arith.mulf %292, %293 : vector<8x96xf32>
    %cst_70 = arith.constant 5.000000e-01 : f32
    %295 = vector.broadcast %cst_70 : f32 to vector<8x96xf32>
    %296 = arith.addf %294, %295 : vector<8x96xf32>
    %297 = vector.extract_strided_slice %296 {offsets = [0, 0], sizes = [8, 32], strides = [1, 1]} : vector<8x96xf32> to vector<8x32xf32>
    %298 = vector.extract_strided_slice %296 {offsets = [0, 32], sizes = [8, 32], strides = [1, 1]} : vector<8x96xf32> to vector<8x32xf32>
    %299 = vector.extract_strided_slice %296 {offsets = [0, 64], sizes = [8, 32], strides = [1, 1]} : vector<8x96xf32> to vector<8x32xf32>
    %300 = vector.extract_strided_slice %291 {offsets = [0, 96], sizes = [8, 32], strides = [1, 1]} : vector<8x128xf32> to vector<8x32xf32>
    %301 = arith.mulf %298, %261 : vector<8x32xf32>
    %302 = arith.mulf %297, %300 : vector<8x32xf32>
    %303 = arith.addf %301, %302 : vector<8x32xf32>
    %304 = math.tanh %303 : vector<8x32xf32>
    %305 = arith.mulf %299, %304 : vector<8x32xf32>
    %306 = math.tanh %290 : vector<8x128xf32>
    %307 = vector.extract_strided_slice %306 {offsets = [0, 0], sizes = [8, 96], strides = [1, 1]} : vector<8x128xf32> to vector<8x96xf32>
    %cst_71 = arith.constant 5.000000e-01 : f32
    %308 = vector.broadcast %cst_71 : f32 to vector<8x96xf32>
    %309 = arith.mulf %307, %308 : vector<8x96xf32>
    %cst_72 = arith.constant 5.000000e-01 : f32
    %310 = vector.broadcast %cst_72 : f32 to vector<8x96xf32>
    %311 = arith.addf %309, %310 : vector<8x96xf32>
    %312 = vector.extract_strided_slice %311 {offsets = [0, 0], sizes = [8, 32], strides = [1, 1]} : vector<8x96xf32> to vector<8x32xf32>
    %313 = vector.extract_strided_slice %311 {offsets = [0, 32], sizes = [8, 32], strides = [1, 1]} : vector<8x96xf32> to vector<8x32xf32>
    %314 = vector.extract_strided_slice %311 {offsets = [0, 64], sizes = [8, 32], strides = [1, 1]} : vector<8x96xf32> to vector<8x32xf32>
    %315 = vector.extract_strided_slice %306 {offsets = [0, 96], sizes = [8, 32], strides = [1, 1]} : vector<8x128xf32> to vector<8x32xf32>
    %316 = arith.mulf %313, %276 : vector<8x32xf32>
    %317 = arith.mulf %312, %315 : vector<8x32xf32>
    %318 = arith.addf %316, %317 : vector<8x32xf32>
    %319 = math.tanh %318 : vector<8x32xf32>
    %320 = arith.mulf %314, %319 : vector<8x32xf32>
    %c7_i32_73 = arith.constant 7 : i32
    %cst_74 = arith.constant dense<0.000000e+00> : vector<8x256xf32>
    %321 = tpu.matmul %305, %8, %cst_74 {dimension_numbers = #tpu.dot_dimension_numbers<[1], [0], [0], [1], [0, 0, 1, 1], [], []>} : vector<8x32xf32>, vector<32x256xf32>, vector<8x256xf32> -> vector<8x256xf32>
    %cst_75 = arith.constant dense<0.000000e+00> : vector<8x128xf32>
    %322 = tpu.matmul %320, %9, %cst_75 {dimension_numbers = #tpu.dot_dimension_numbers<[1], [0], [0], [1], [0, 0, 1, 1], [], []>} : vector<8x32xf32>, vector<32x128xf32>, vector<8x128xf32> -> vector<8x128xf32>
    %323 = vector.extract_strided_slice %321 {offsets = [0, 128], sizes = [8, 128], strides = [1, 1]} : vector<8x256xf32> to vector<8x128xf32>
    %324 = arith.addf %323, %322 : vector<8x128xf32>
    %325 = vector.broadcast %10 : vector<1x128xf32> to vector<8x128xf32>
    %326 = arith.addf %324, %325 : vector<8x128xf32>
    %327 = math.tanh %326 : vector<8x128xf32>
    %328 = vector.extract_strided_slice %327 {offsets = [0, 0], sizes = [8, 96], strides = [1, 1]} : vector<8x128xf32> to vector<8x96xf32>
    %cst_76 = arith.constant 5.000000e-01 : f32
    %329 = vector.broadcast %cst_76 : f32 to vector<8x96xf32>
    %330 = arith.mulf %328, %329 : vector<8x96xf32>
    %cst_77 = arith.constant 5.000000e-01 : f32
    %331 = vector.broadcast %cst_77 : f32 to vector<8x96xf32>
    %332 = arith.addf %330, %331 : vector<8x96xf32>
    %333 = vector.extract_strided_slice %332 {offsets = [0, 0], sizes = [8, 32], strides = [1, 1]} : vector<8x96xf32> to vector<8x32xf32>
    %334 = vector.extract_strided_slice %332 {offsets = [0, 32], sizes = [8, 32], strides = [1, 1]} : vector<8x96xf32> to vector<8x32xf32>
    %335 = vector.extract_strided_slice %332 {offsets = [0, 64], sizes = [8, 32], strides = [1, 1]} : vector<8x96xf32> to vector<8x32xf32>
    %336 = vector.extract_strided_slice %327 {offsets = [0, 96], sizes = [8, 32], strides = [1, 1]} : vector<8x128xf32> to vector<8x32xf32>
    %337 = arith.mulf %334, %318 : vector<8x32xf32>
    %338 = arith.mulf %333, %336 : vector<8x32xf32>
    %339 = arith.addf %337, %338 : vector<8x32xf32>
    %340 = math.tanh %339 : vector<8x32xf32>
    %341 = arith.mulf %335, %340 : vector<8x32xf32>
    %c0_78 = arith.constant 0 : index
    %c0_79 = arith.constant 0 : index
    %342 = vector.load %arg6[%c0_78, %c0_79] : memref<32x128xf32, #tpu.memory_space<vmem>>, vector<32x128xf32>
    %cst_80 = arith.constant dense<0.000000e+00> : vector<8x128xf32>
    %343 = tpu.matmul %341, %342, %cst_80 {dimension_numbers = #tpu.dot_dimension_numbers<[1], [0], [0], [1], [0, 0, 1, 1], [], []>} : vector<8x32xf32>, vector<32x128xf32>, vector<8x128xf32> -> vector<8x128xf32>
    %c0_81 = arith.constant 0 : index
    %c0_82 = arith.constant 0 : index
    %344 = vector.load %arg7[%c0_81, %c0_82] : memref<1x128xf32, #tpu.memory_space<vmem>>, vector<1x128xf32>
    %345 = vector.broadcast %344 : vector<1x128xf32> to vector<8x128xf32>
    %346 = arith.addf %343, %345 : vector<8x128xf32>
    %347 = math.tanh %346 : vector<8x128xf32>
    %cst_83 = arith.constant 3.140000e+00 : f32
    %348 = vector.broadcast %cst_83 : f32 to vector<8x128xf32>
    %349 = arith.mulf %347, %348 : vector<8x128xf32>
    %c0_84 = arith.constant 0 : index
    %c0_85 = arith.constant 0 : index
    %350 = vector.load %arg8[%c0_84, %c0_85] : memref<8x128xf32, #tpu.memory_space<vmem>>, vector<8x128xf32>
    tpu.vector_store %arg8[%c0_84, %c0_85], %349 {strides = array<i32>} : memref<8x128xf32, #tpu.memory_space<vmem>>, vector<8x128xf32>,
    return
  }
}

</mosaic_0001>

<bundles_post_ra>
// kernel: tpu_custom_call.1
= control target key start
LH: loop header
LB: loop body
LE: loop exit
PB: predicated region body
PF: predicated region fallthrough
CT: control target
= control target key end

     0   :  { %13 = vsyncpa [#allocation4], 0  ;;  %s2683_s0 = inlined_call_operand.vmem [shape: f32[64,8], index: 0, kind: input, shape index: {}]   ;;  %s2684_s1 = inlined_call_operand.vmem [shape: f32[8,128], index: 1, kind: input, shape index: {}]   ;;  %s2685_s2 = inlined_call_operand.vmem [shape: f32[1,128], index: 2, kind: input, shape index: {}]   ;;  %s2686_s3 = inlined_call_operand.vmem [shape: f32[32,256], index: 3, kind: input, shape index: {}]   ;;  %s2687_s4 = inlined_call_operand.hbm [shape: f32[32,128], index: 4, kind: input, shape index: {}]   ;;  %s2688_s5 = inlined_call_operand.vmem [shape: f32[1,128], index: 5, kind: input, shape index: {}]   ;;  %s2689_s6 = inlined_call_operand.hbm [shape: f32[32,128], index: 6, kind: input, shape index: {}]   ;;  %s2690_s7 = inlined_call_operand.vmem [shape: f32[1,128], index: 7, kind: input, shape index: {}]   ;;  %s2691_s8 = inlined_call_operand.hbm [shape: f32[8,128], index: 8, kind: output, shape index: {}]  }
   0x1   :  { %14 = vsyncpa [#allocation7], 0 }
   0x2   :  { %15 = vsyncpa [#allocation5], 0  ;;  %s2235_s27 = smov [#allocation3]  }
   0x3   :  { %s29_s28 = sshll.u32 %s2235_s27, 4  ;;  %s30_s28 = int_to_ptr.vmem [resolvable:$true] %s29_s28 }
   0x4   :  { %s2177_s29 = scalar_lea.vmem %s30_s28, 512  ;;  %p2182_p1 = scmp.lt.s32.totalorder %s30_s28, %s30_s28 }
   0x5   :  { %p2178_p0 = scmp.ne.s32.totalorder %s30_s28, %s2177_s29  ;;  %p2183_p2 = scmp.lt.s32.totalorder %s2177_s29, %s2177_s29 }
   0x7   :  { %p2184_p3 = por %p2183_p2, %p2182_p1 }
   0x9   :  { %p2185_p4 = pnand %p2184_p3, %p2178_p0 }
   0xb   :  { %2188 = shalt.err (!%p2185_p4)
}
   0xc   :  { %s2236_s30 = smov 128   ;;  %s2237_s9 = smov 8  }
   0xd   :  { %35 = dma.hbm_to_vmem [thread:$0]  %s2687_s4, 512, %s30_s28, [#allocation4], %s2236_s30, %s2236_s30, %s2237_s9  }
   0xe   :  { %s2238_s12 = smov [#allocation6]  }
   0xf   :  { %s43_s13 = sshll.u32 %s2238_s12, 4  ;;  %s44_s13 = int_to_ptr.vmem [resolvable:$true] %s43_s13 }
  0x10   :  { %s2197_s14 = scalar_lea.vmem %s44_s13, 512  ;;  %p2202_p6 = scmp.lt.s32.totalorder %s44_s13, %s44_s13 }
  0x11   :  { %p2198_p5 = scmp.ne.s32.totalorder %s44_s13, %s2197_s14  ;;  %p2203_p7 = scmp.lt.s32.totalorder %s2197_s14, %s2197_s14 }
  0x13   :  { %p2204_p8 = por %p2203_p7, %p2202_p6 }
  0x15   :  { %p2205_p9 = pnand %p2204_p8, %p2198_p5 }
  0x17   :  { %2208 = shalt.err (!%p2205_p9)
}
  0x18   :  { %49 = dma.hbm_to_vmem [thread:$0]  %s2689_s6, 512, %s44_s13, [#allocation7], %s2236_s30, %s2236_s30, %s2237_s9  }
  0x19   :  { %2229 = dma.done.wait [#allocation4], 512  }
  0x1a   :  { %2230 = vsyncadd [#allocation4], 4294966784 }
  0x1b   :  { %2231 = dma.done.wait [#allocation7], 512  }
  0x1c   :  { %2232 = vsyncadd [#allocation7], 4294966784  ;;  %vm74_vm0 = vcmask 64512   ;;  %v58_v0 = vld [vmem:[%s2684_s1] sm:$0xff]  ;;  %v60_v2 = vld [vmem:[%s2683_s0 + $0x8] sm:$0xff]  ;;  %s2239_s1 = smov 32  }
  0x1d   :  { %v59_v1 = vld [vmem:[%s2683_s0] sm:$0xff]  ;;  %1981 = vmatprep.subr.mxu0 %v58_v0  ;;  %v2322_v15 = vld [vmem:[%s2686_s3 + $0x38] sm:$0xff]  ;;  %v2327_v16 = vld [vmem:[%s2686_s3 + $0x30] sm:$0xff]  ;;  %v2240_v19 = vmov 0.0   ;;  %vm249_vm1 = vcmask 261120   ;;  %vm2242_vm2 = vmmov 0  }
  0x1e   :  { %1983 = vmatprep.mubr.msk.f32.mxu0 %vm74_vm0, %v59_v1  ;;  %1982 = vmatpush3.msra.mxu0 %v58_v0  ;;  %v2311_v4 = vld [vmem:[%s2685_s2] ss:$0 sm:$0xff]  ;;  %v2332_v17 = vld [vmem:[%s2686_s3 + $0x28] sm:$0xff]  ;;  %v2345_v20 = vld [vmem:[%s2686_s3 + $0x18] sm:$0xff]  ;;  %s2243_s27 = smov [#allocation8]  }
  0x1f   :  { %1984 = vmatmul.mubr.msk.f32.vlgmr.msra.gmra.mxu0 %vm74_vm0, %v60_v2  ;;  %276 = vmatprep.subr.mxu1 %v2322_v15  ;;  %v2338_v18 = vld [vmem:[%s2686_s3 + $0x20] sm:$0xff]  ;;  %v2352_v21 = vld [vmem:[%s2686_s3 + $0x10] sm:$0xff]  ;;  %v2359_v22 = vld [vmem:[%s2686_s3 + $0x8] sm:$0xff]  ;;  %s1890_s28 = sshll.u32 %s2243_s27, 4  ;;  %s1891_s28 = int_to_ptr.vmem [resolvable:$true] %s1890_s28 }
  0x20   :  { %316 = vmatprep.mubr.f32.mxu1 %v2240_v19  ;;  %277 = vmatpush1.msra.mxu1 %v2327_v16  ;;  %v2366_v23 = vld [vmem:[%s2686_s3] sm:$0xff]  ;;  %s2241_s3 = smov 64   ;;  %v2380_v27 = vld [vmem:[#allocation3 + $0x18] sm:$0xff]  ;;  %v2383_v29 = vld [vmem:[#allocation3 + $0x10] sm:$0xff]  ;;  %p2214_p11 = scmp.lt.s32.totalorder %s1891_s28, %s1891_s28 }
  0x21   :  { %476 = vmatprep.subr.mxu0 %v2322_v15  ;;  %278 = vmatprep.subr.mxu1 %v2332_v17  ;;  %v2389_v30 = vld [vmem:[#allocation3 + $0x8] sm:$0xff]  ;;  %v2393_v31 = vld [vmem:[#allocation3] sm:$0xff]  ;;  %v61_v58 = vld [vmem:[%s2683_s0 + $0x10] sm:$0xff] }
  0x22   :  { %477 = vmatpush1.msra.mxu0 %v2327_v16  ;;  %279 = vmatpush1.msra.mxu1 %v2338_v18  ;;  %v2415_v36 = vld [vmem:[%s2688_s5] ss:$0 sm:$0xff]  ;;  %v62_v59 = vld [vmem:[%s2683_s0 + $0x18] sm:$0xff]  ;;  %v64_v61 = vld [vmem:[%s2683_s0 + $0x28] sm:$0xff] }
  0x23   :  { %478 = vmatprep.subr.mxu0 %v2332_v17  ;;  %280 = vmatprep.subr.mxu1 %v2345_v20  ;;  %v63_v60 = vld [vmem:[%s2683_s0 + $0x20] sm:$0xff]  ;;  %v65_v62 = vld [vmem:[%s2683_s0 + $0x30] sm:$0xff]  ;;  %v66_v63 = vld [vmem:[%s2683_s0 + $0x38] sm:$0xff] }
  0x24   :  { %479 = vmatpush1.msra.mxu0 %v2338_v18  ;;  %281 = vmatpush1.msra.mxu1 %v2352_v21 }
  0x25   :  { %480 = vmatprep.subr.mxu0 %v2345_v20  ;;  %282 = vmatprep.subr.mxu1 %v2359_v22 }
  0x26   :  { %481 = vmatpush1.msra.mxu0 %v2352_v21  ;;  %283 = vmatpush1.msra.mxu1 %v2366_v23 }
  0x27   :  { %482 = vmatprep.subr.mxu0 %v2359_v22  ;;  %1995 = vmatprep.subr.mxu1 %v2240_v19 }
  0x28   :  { %483 = vmatpush1.msra.mxu0 %v2366_v23  ;;  %1986 = vmatprep.mubr.msk.f32.mxu0 %vm74_vm0, %v61_v58 }
  0x29   :  { %672 = vmatprep.subr.mxu0 %v2322_v15  ;;  %1987 = vmatmul.mubr.msk.f32.gmra.mxu0 %vm74_vm0, %v62_v59 }
  0x2a   :  { %1989 = vmatprep.mubr.msk.f32.mxu0 %vm74_vm0, %v63_v60 }
  0x2d   :  { %1990 = vmatmul.mubr.msk.f32.gmra.mxu0 %vm74_vm0, %v64_v61 }
  0x2e   :  { %1992 = vmatprep.mubr.msk.f32.mxu0 %vm74_vm0, %v65_v62 }
  0x31   :  { %1993 = vmatmul.mubr.msk.f32.gmra.mxu0 %vm74_vm0, %v66_v63 }
  0x32   :  { %516 = vmatprep.mubr.f32.mxu0 %v2240_v19 }
  0xdf   :  { %v2306_v3 = vpop.f32.mrf.mxu0 }
  0xe0   :  { %v171_v32 = vadd.f32 %v2306_v3, %v2311_v4 }
  0xe1   :  { %v165_v5 = vpop.f32.mrf.mxu0 }
  0xe2   :  { %v166_v6 = vadd.f32 %v2311_v4, %v165_v5 }
  0xe4   :  { %2103 = vtanh.f32 %v166_v6 }
  0xf1   :  { %v2104_v7 = vpop.eup %2103 }
  0xf2   :  { %231 = vrot.lane.b32.xlu0 %v2104_v7, %s2239_s1  ;;  %v227_v8 = vmul.f32 0.5, %v2104_v7 }
  0xf4   :  { %v228_v9 = vadd.f32 0.5, %v227_v8  ;;  %v2479_v8 = vpop.f32.mrf.mxu0 }
  0xf5   :  { %v181_v60 = vadd.f32 %v2479_v8, %v2311_v4 }
  0xf6   :  { %v229_v12 = vmul.f32 0.0, %v228_v9 }
 0x164   :  { %v232_v10 = vpop.permute.xlu0 %231 }
 0x165   :  { %v234_v11 = vmul.f32 %v232_v10, %v228_v9 }
 0x167   :  { %236 = vrot.lane.b32.xlu0 %v234_v11, %s2239_s1 }
 0x1d9   :  { %v237_v13 = vpop.permute.xlu0 %236 }
 0x1da   :  { %v2316_v14 = vadd.f32 %v237_v13, %v229_v12 }
 0x1dc   :  { %2105 = vtanh.f32 %v2316_v14 }
 0x1e9   :  { %v2106_v24 = vpop.eup %2105 }
 0x1ea   :  { %242 = vrot.lane.b32.xlu1 %v2106_v24, %s2239_s1 }
 0x25c   :  { %v243_v25 = vpop.permute.xlu1 %242 }
 0x25d   :  { %v245_v26 = vmul.f32 %v243_v25, %v228_v9  ;;  %v175_v9 = vpop.f32.mrf.mxu0 }
 0x25f   :  { %247 = vrot.lane.b32.xlu1 %v245_v26, %s2241_s3  ;;  %v2481_v10 = vpop.f32.mrf.mxu0 }
 0x261   :  { %v2483_v11 = vpop.f32.mrf.mxu0 }
 0x263   :  { %v2485_v12 = vpop.f32.mrf.mxu0 }
 0x265   :  { %v2487_v13 = vpop.f32.mrf.mxu0 }
 0x2d1   :  { %v248_v28 = vpop.permute.xlu1 %247 }
 0x2d2   :  { %1909 = vmatmul.mubr.msk.f32.vlgmr.msra.gmra.mxu1 %vm249_vm1, %v248_v28 }
 0x2d3   :  { %1996 = vmatpush3.msra.mxu1 %v2380_v27  ;;  %2003 = vmatprep.mubr.msk.f32.mxu1 %vm2242_vm2, %v2240_v19 }
 0x2d4   :  { %1997 = vmatprep.subr.mxu1 %v2240_v19 }
 0x2d5   :  { %1998 = vmatpush3.msra.mxu1 %v2383_v29 }
 0x2d6   :  { %1999 = vmatprep.subr.mxu1 %v2240_v19 }
 0x2d7   :  { %2000 = vmatpush3.msra.mxu1 %v2389_v30 }
 0x2d8   :  { %2001 = vmatprep.subr.mxu1 %v2240_v19 }
 0x2d9   :  { %2002 = vmatpush3.msra.mxu1 %v2393_v31 }
 0x2da   :  { %2004 = vmatmul.mubr.f32.vlgmr.msra.gmra.mxu1 %v2240_v19  ;;  %2006 = vmatprep.subr.mxu1 %v2240_v19 }
 0x2db   :  { %2007 = vmatpush3.msra.mxu1 %v2380_v27  ;;  %2014 = vmatprep.mubr.msk.f32.mxu1 %vm2242_vm2, %v2240_v19 }
 0x2dc   :  { %2008 = vmatprep.subr.mxu1 %v2240_v19 }
 0x2dd   :  { %2009 = vmatpush3.msra.mxu1 %v2383_v29 }
 0x2de   :  { %2010 = vmatprep.subr.mxu1 %v2240_v19 }
 0x2df   :  { %2011 = vmatpush3.msra.mxu1 %v2389_v30 }
 0x2e0   :  { %2012 = vmatprep.subr.mxu1 %v2240_v19 }
 0x2e1   :  { %2013 = vmatpush3.msra.mxu1 %v2393_v31 }
 0x2e2   :  { %2017 = vmatprep.subr.mxu1 %v2240_v19 }
 0x392   :  { %v318_v33 = vpop.f32.mrf.mxu1 }
 0x393   :  { %v398_v34 = vadd.f32 %v318_v33, %v171_v32 }
 0x394   :  { %v320_v35 = vpop.f32.mrf.mxu1 }
 0x395   :  { %2107 = vtanh.f32 %v398_v34 }
 0x39a   :  { %v392_v37 = vpop.f32.mrf.mxu1 }
 0x39b   :  { %v399_v38 = vadd.f32 %v392_v37, %v320_v35 }
 0x39c   :  { %v2005_v39 = vpop.f32.mrf.mxu1 }
 0x39d   :  { %v406_v40 = vadd.f32 %v2415_v36, %v399_v38 }
 0x39f   :  { %2109 = vtanh.f32 %v406_v40 }
 0x3a2   :  { %v2108_v41 = vpop.eup %2107 }
 0x3a3   :  { %412 = vrot.lane.b32.xlu0 %v2108_v41, %s2239_s1  ;;  %v408_v43 = vmul.f32 0.5, %v2108_v41 }
 0x3a5   :  { %v409_v44 = vadd.f32 0.5, %v408_v43 }
 0x3a7   :  { %v410_v51 = vmul.f32 %v409_v44, %v2316_v14  ;;  %v176_v14 = vadd.f32 %v2311_v4, %v175_v9 }
 0x3ac   :  { %v2110_v42 = vpop.eup %2109 }
 0x3ad   :  { %432 = vrot.lane.b32.xlu1 %v2110_v42, %s2239_s1  ;;  %v428_v47 = vmul.f32 0.5, %v2110_v42 }
 0x3af   :  { %v429_v48 = vadd.f32 0.5, %v428_v47 }
 0x3b1   :  { %v430_v54 = vmul.f32 0.0, %v429_v48 }
 0x415   :  { %v413_v45 = vpop.permute.xlu0 %412 }
 0x416   :  { %v415_v46 = vmul.f32 %v413_v45, %v409_v44 }
 0x418   :  { %417 = vrot.lane.b32.xlu0 %v415_v46, %s2239_s1 }
 0x41f   :  { %v433_v49 = vpop.permute.xlu1 %432 }
 0x420   :  { %v435_v50 = vmul.f32 %v433_v49, %v429_v48 }
 0x422   :  { %437 = vrot.lane.b32.xlu1 %v435_v50, %s2239_s1 }
 0x48a   :  { %v418_v52 = vpop.permute.xlu0 %417 }
 0x48b   :  { %v2423_v53 = vadd.f32 %v418_v52, %v410_v51 }
 0x48d   :  { %2111 = vtanh.f32 %v2423_v53 }
 0x494   :  { %v438_v55 = vpop.permute.xlu1 %437 }
 0x495   :  { %v2426_v56 = vadd.f32 %v438_v55, %v430_v54 }
 0x497   :  { %2113 = vtanh.f32 %v2426_v56 }
 0x49a   :  { %v2112_v57 = vpop.eup %2111 }
 0x49b   :  { %423 = vrot.lane.b32.xlu0 %v2112_v57, %s2239_s1 }
 0x4a4   :  { %v2114_v0 = vpop.eup %2113 }
 0x4a5   :  { %443 = vrot.lane.b32.xlu1 %v2114_v0, %s2239_s1 }
 0x50d   :  { %v424_v1 = vpop.permute.xlu0 %423 }
 0x50e   :  { %v426_v2 = vmul.f32 %v424_v1, %v409_v44 }
 0x510   :  { %448 = vrot.lane.b32.xlu0 %v426_v2, %s2241_s3 }
 0x517   :  { %v444_v3 = vpop.permute.xlu1 %443 }
 0x518   :  { %v446_v5 = vmul.f32 %v444_v3, %v429_v48 }
 0x51a   :  { %524 = vrot.lane.b32.xlu1 %v446_v5, %s2241_s3 }
 0x582   :  { %v449_v6 = vpop.permute.xlu0 %448 }
 0x583   :  { %1911 = vmatmul.mubr.msk.f32.vlgmr.msra.gmra.mxu0 %vm249_vm1, %v449_v6 }
 0x584   :  { %673 = vmatpush1.msra.mxu0 %v2327_v16  ;;  %712 = vmatprep.mubr.f32.mxu0 %v2240_v19 }
 0x585   :  { %674 = vmatprep.subr.mxu0 %v2332_v17 }
 0x586   :  { %675 = vmatpush1.msra.mxu0 %v2338_v18 }
 0x587   :  { %676 = vmatprep.subr.mxu0 %v2345_v20 }
 0x588   :  { %677 = vmatpush1.msra.mxu0 %v2352_v21 }
 0x589   :  { %678 = vmatprep.subr.mxu0 %v2359_v22 }
 0x58a   :  { %679 = vmatpush1.msra.mxu0 %v2366_v23 }
 0x58b   :  { %868 = vmatprep.subr.mxu0 %v2322_v15 }
 0x58c   :  { %v525_v7 = vpop.permute.xlu1 %524 }
 0x58d   :  { %2015 = vmatmul.mubr.msk.f32.vlgmr.msra.gmra.mxu1 %vm249_vm1, %v525_v7 }
 0x58e   :  { %2018 = vmatpush3.msra.mxu1 %v2380_v27  ;;  %2025 = vmatprep.mubr.msk.f32.mxu1 %vm2242_vm2, %v2240_v19 }
 0x58f   :  { %2019 = vmatprep.subr.mxu1 %v2240_v19 }
 0x590   :  { %2020 = vmatpush3.msra.mxu1 %v2383_v29 }
 0x591   :  { %2021 = vmatprep.subr.mxu1 %v2240_v19 }
 0x592   :  { %2022 = vmatpush3.msra.mxu1 %v2389_v30 }
 0x593   :  { %2023 = vmatprep.subr.mxu1 %v2240_v19 }
 0x594   :  { %2024 = vmatpush3.msra.mxu1 %v2393_v31 }
 0x595   :  { %2028 = vmatprep.subr.mxu1 %v2240_v19 }
 0x643   :  { %v518_v24 = vpop.f32.mrf.mxu0 }
 0x644   :  { %v600_v25 = vadd.f32 %v518_v24, %v176_v14 }
 0x645   :  { %v520_v26 = vpop.f32.mrf.mxu0 }
 0x646   :  { %2115 = vtanh.f32 %v600_v25 }
 0x64d   :  { %v594_v28 = vpop.f32.mrf.mxu1 }
 0x64e   :  { %v601_v32 = vadd.f32 %v594_v28, %v520_v26 }
 0x64f   :  { %v2016_v33 = vpop.f32.mrf.mxu1 }
 0x650   :  { %v602_v34 = vadd.f32 %v2415_v36, %v601_v32 }
 0x652   :  { %2117 = vtanh.f32 %v602_v34 }
 0x653   :  { %v2116_v35 = vpop.eup %2115 }
 0x654   :  { %608 = vrot.lane.b32.xlu0 %v2116_v35, %s2239_s1  ;;  %v604_v38 = vmul.f32 0.5, %v2116_v35 }
 0x656   :  { %v605_v39 = vadd.f32 0.5, %v604_v38 }
 0x658   :  { %v606_v46 = vmul.f32 %v605_v39, %v2423_v53 }
 0x65f   :  { %v2118_v37 = vpop.eup %2117 }
 0x660   :  { %628 = vrot.lane.b32.xlu1 %v2118_v37, %s2239_s1  ;;  %v624_v42 = vmul.f32 0.5, %v2118_v37 }
 0x662   :  { %v625_v43 = vadd.f32 0.5, %v624_v42 }
 0x664   :  { %v626_v49 = vmul.f32 %v625_v43, %v2426_v56 }
 0x6c6   :  { %v609_v40 = vpop.permute.xlu0 %608 }
 0x6c7   :  { %v611_v41 = vmul.f32 %v609_v40, %v605_v39 }
 0x6c9   :  { %613 = vrot.lane.b32.xlu0 %v611_v41, %s2239_s1 }
 0x6d2   :  { %v629_v44 = vpop.permute.xlu1 %628 }
 0x6d3   :  { %v631_v45 = vmul.f32 %v629_v44, %v625_v43 }
 0x6d5   :  { %633 = vrot.lane.b32.xlu1 %v631_v45, %s2239_s1 }
 0x73b   :  { %v614_v47 = vpop.permute.xlu0 %613 }
 0x73c   :  { %v616_v48 = vadd.f32 %v614_v47, %v606_v46  ;;  %v186_v47 = vadd.f32 %v2311_v4, %v2483_v11 }
 0x73e   :  { %2119 = vtanh.f32 %v616_v48 }
 0x747   :  { %v634_v50 = vpop.permute.xlu1 %633 }
 0x748   :  { %v636_v51 = vadd.f32 %v634_v50, %v626_v49 }
 0x74a   :  { %2121 = vtanh.f32 %v636_v51 }
 0x74b   :  { %v2120_v52 = vpop.eup %2119 }
 0x74c   :  { %619 = vrot.lane.b32.xlu0 %v2120_v52, %s2239_s1 }
 0x757   :  { %v2122_v54 = vpop.eup %2121 }
 0x758   :  { %639 = vrot.lane.b32.xlu1 %v2122_v54, %s2239_s1 }
 0x7be   :  { %v620_v55 = vpop.permute.xlu0 %619 }
 0x7bf   :  { %v622_v57 = vmul.f32 %v620_v55, %v605_v39 }
 0x7c1   :  { %644 = vrot.lane.b32.xlu0 %v622_v57, %s2241_s3 }
 0x7ca   :  { %v640_v58 = vpop.permute.xlu1 %639 }
 0x7cb   :  { %v642_v53 = vmul.f32 %v640_v58, %v625_v43 }
 0x7cd   :  { %720 = vrot.lane.b32.xlu1 %v642_v53, %s2241_s3 }
 0x833   :  { %v645_v59 = vpop.permute.xlu0 %644 }
 0x834   :  { %1913 = vmatmul.mubr.msk.f32.vlgmr.msra.gmra.mxu0 %vm249_vm1, %v645_v59 }
 0x835   :  { %869 = vmatpush1.msra.mxu0 %v2327_v16  ;;  %908 = vmatprep.mubr.f32.mxu0 %v2240_v19 }
 0x836   :  { %870 = vmatprep.subr.mxu0 %v2332_v17 }
 0x837   :  { %871 = vmatpush1.msra.mxu0 %v2338_v18 }
 0x838   :  { %872 = vmatprep.subr.mxu0 %v2345_v20 }
 0x839   :  { %873 = vmatpush1.msra.mxu0 %v2352_v21 }
 0x83a   :  { %874 = vmatprep.subr.mxu0 %v2359_v22 }
 0x83b   :  { %875 = vmatpush1.msra.mxu0 %v2366_v23 }
 0x83c   :  { %1064 = vmatprep.subr.mxu0 %v2322_v15 }
 0x83f   :  { %v721_v56 = vpop.permute.xlu1 %720 }
 0x840   :  { %2026 = vmatmul.mubr.msk.f32.vlgmr.msra.gmra.mxu1 %vm249_vm1, %v721_v56 }
 0x841   :  { %2029 = vmatpush3.msra.mxu1 %v2380_v27  ;;  %2036 = vmatprep.mubr.msk.f32.mxu1 %vm2242_vm2, %v2240_v19 }
 0x842   :  { %2030 = vmatprep.subr.mxu1 %v2240_v19 }
 0x843   :  { %2031 = vmatpush3.msra.mxu1 %v2383_v29 }
 0x844   :  { %2032 = vmatprep.subr.mxu1 %v2240_v19 }
 0x845   :  { %2033 = vmatpush3.msra.mxu1 %v2389_v30 }
 0x846   :  { %2034 = vmatprep.subr.mxu1 %v2240_v19 }
 0x847   :  { %2035 = vmatpush3.msra.mxu1 %v2393_v31 }
 0x848   :  { %2039 = vmatprep.subr.mxu1 %v2240_v19 }
 0x8f4   :  { %v714_v61 = vpop.f32.mrf.mxu0 }
 0x8f5   :  { %v796_v62 = vadd.f32 %v714_v61, %v181_v60 }
 0x8f6   :  { %v716_v63 = vpop.f32.mrf.mxu0 }
 0x8f7   :  { %2123 = vtanh.f32 %v796_v62 }
 0x900   :  { %v790_v0 = vpop.f32.mrf.mxu1 }
 0x901   :  { %v797_v1 = vadd.f32 %v790_v0, %v716_v63 }
 0x902   :  { %v2027_v2 = vpop.f32.mrf.mxu1 }
 0x903   :  { %v798_v3 = vadd.f32 %v2415_v36, %v797_v1 }
 0x904   :  { %v2124_v5 = vpop.eup %2123 }
 0x905   :  { %2125 = vtanh.f32 %v798_v3  ;;  %804 = vrot.lane.b32.xlu0 %v2124_v5, %s2239_s1  ;;  %v800_v7 = vmul.f32 0.5, %v2124_v5 }
 0x907   :  { %v801_v9 = vadd.f32 0.5, %v800_v7 }
 0x909   :  { %v802_v32 = vmul.f32 %v801_v9, %v616_v48 }
 0x912   :  { %v2126_v6 = vpop.eup %2125 }
 0x913   :  { %824 = vrot.lane.b32.xlu1 %v2126_v6, %s2239_s1  ;;  %v820_v24 = vmul.f32 0.5, %v2126_v6 }
 0x915   :  { %v821_v25 = vadd.f32 0.5, %v820_v24 }
 0x917   :  { %v822_v35 = vmul.f32 %v821_v25, %v636_v51 }
 0x977   :  { %v805_v14 = vpop.permute.xlu0 %804 }
 0x978   :  { %v807_v8 = vmul.f32 %v805_v14, %v801_v9 }
 0x97a   :  { %809 = vrot.lane.b32.xlu0 %v807_v8, %s2239_s1 }
 0x985   :  { %v825_v26 = vpop.permute.xlu1 %824 }
 0x986   :  { %v827_v28 = vmul.f32 %v825_v26, %v821_v25 }
 0x988   :  { %829 = vrot.lane.b32.xlu1 %v827_v28, %s2239_s1 }
 0x9ec   :  { %v810_v33 = vpop.permute.xlu0 %809 }
 0x9ed   :  { %v812_v34 = vadd.f32 %v810_v33, %v802_v32  ;;  %v191_v32 = vadd.f32 %v2481_v10, %v2311_v4 }
 0x9ef   :  { %2127 = vtanh.f32 %v812_v34 }
 0x9fa   :  { %v830_v37 = vpop.permute.xlu1 %829 }
 0x9fb   :  { %v832_v38 = vadd.f32 %v830_v37, %v822_v35 }
 0x9fc   :  { %v2128_v39 = vpop.eup %2127 }
 0x9fd   :  { %2129 = vtanh.f32 %v832_v38  ;;  %815 = vrot.lane.b32.xlu0 %v2128_v39, %s2239_s1 }
 0xa0a   :  { %v2130_v40 = vpop.eup %2129 }
 0xa0b   :  { %835 = vrot.lane.b32.xlu1 %v2130_v40, %s2239_s1 }
 0xa6f   :  { %v816_v41 = vpop.permute.xlu0 %815 }
 0xa70   :  { %v818_v42 = vmul.f32 %v816_v41, %v801_v9 }
 0xa72   :  { %840 = vrot.lane.b32.xlu0 %v818_v42, %s2241_s3 }
 0xa7d   :  { %v836_v43 = vpop.permute.xlu1 %835 }
 0xa7e   :  { %v838_v44 = vmul.f32 %v836_v43, %v821_v25 }
 0xa80   :  { %916 = vrot.lane.b32.xlu1 %v838_v44, %s2241_s3 }
 0xae4   :  { %v841_v45 = vpop.permute.xlu0 %840 }
 0xae5   :  { %1915 = vmatmul.mubr.msk.f32.vlgmr.msra.gmra.mxu0 %vm249_vm1, %v841_v45 }
 0xae6   :  { %1065 = vmatpush1.msra.mxu0 %v2327_v16  ;;  %1104 = vmatprep.mubr.f32.mxu0 %v2240_v19 }
 0xae7   :  { %1066 = vmatprep.subr.mxu0 %v2332_v17 }
 0xae8   :  { %1067 = vmatpush1.msra.mxu0 %v2338_v18 }
 0xae9   :  { %1068 = vmatprep.subr.mxu0 %v2345_v20 }
 0xaea   :  { %1069 = vmatpush1.msra.mxu0 %v2352_v21 }
 0xaeb   :  { %1070 = vmatprep.subr.mxu0 %v2359_v22 }
 0xaec   :  { %1071 = vmatpush1.msra.mxu0 %v2366_v23 }
 0xaed   :  { %1260 = vmatprep.subr.mxu0 %v2322_v15 }
 0xaf2   :  { %v917_v46 = vpop.permute.xlu1 %916 }
 0xaf3   :  { %2037 = vmatmul.mubr.msk.f32.vlgmr.msra.gmra.mxu1 %vm249_vm1, %v917_v46 }
 0xaf4   :  { %2040 = vmatpush3.msra.mxu1 %v2380_v27  ;;  %2047 = vmatprep.mubr.msk.f32.mxu1 %vm2242_vm2, %v2240_v19 }
 0xaf5   :  { %2041 = vmatprep.subr.mxu1 %v2240_v19 }
 0xaf6   :  { %2042 = vmatpush3.msra.mxu1 %v2383_v29 }
 0xaf7   :  { %2043 = vmatprep.subr.mxu1 %v2240_v19 }
 0xaf8   :  { %2044 = vmatpush3.msra.mxu1 %v2389_v30 }
 0xaf9   :  { %2045 = vmatprep.subr.mxu1 %v2240_v19 }
 0xafa   :  { %2046 = vmatpush3.msra.mxu1 %v2393_v31 }
 0xafb   :  { %2050 = vmatprep.subr.mxu1 %v2240_v19 }
 0xba5   :  { %v910_v48 = vpop.f32.mrf.mxu0 }
 0xba6   :  { %v992_v49 = vadd.f32 %v910_v48, %v186_v47 }
 0xba7   :  { %v912_v50 = vpop.f32.mrf.mxu0 }
 0xba8   :  { %2131 = vtanh.f32 %v992_v49 }
 0xbb3   :  { %v986_v51 = vpop.f32.mrf.mxu1 }
 0xbb4   :  { %v993_v52 = vadd.f32 %v986_v51, %v912_v50 }
 0xbb5   :  { %v2132_v54 = vpop.eup %2131  ;;  %v2038_v55 = vpop.f32.mrf.mxu1 }
 0xbb6   :  { %v994_v57 = vadd.f32 %v2415_v36, %v993_v52  ;;  %1000 = vrot.lane.b32.xlu0 %v2132_v54, %s2239_s1  ;;  %v996_v53 = vmul.f32 0.5, %v2132_v54 }
 0xbb8   :  { %2133 = vtanh.f32 %v994_v57  ;;  %v997_v59 = vadd.f32 0.5, %v996_v53 }
 0xbba   :  { %v998_v0 = vmul.f32 %v997_v59, %v812_v34 }
 0xbc5   :  { %v2134_v58 = vpop.eup %2133 }
 0xbc6   :  { %1020 = vrot.lane.b32.xlu1 %v2134_v58, %s2239_s1  ;;  %v1016_v60 = vmul.f32 0.5, %v2134_v58 }
 0xbc8   :  { %v1017_v61 = vadd.f32 0.5, %v1016_v60 }
 0xbca   :  { %v1018_v3 = vmul.f32 %v1017_v61, %v832_v38 }
 0xc28   :  { %v1001_v56 = vpop.permute.xlu0 %1000 }
 0xc29   :  { %v1003_v11 = vmul.f32 %v1001_v56, %v997_v59 }
 0xc2b   :  { %1005 = vrot.lane.b32.xlu0 %v1003_v11, %s2239_s1 }
 0xc38   :  { %v1021_v62 = vpop.permute.xlu1 %1020 }
 0xc39   :  { %v1023_v63 = vmul.f32 %v1021_v62, %v1017_v61 }
 0xc3b   :  { %1025 = vrot.lane.b32.xlu1 %v1023_v63, %s2239_s1 }
 0xc9d   :  { %v1006_v1 = vpop.permute.xlu0 %1005 }
 0xc9e   :  { %v1008_v2 = vadd.f32 %v1006_v1, %v998_v0 }
 0xca0   :  { %2135 = vtanh.f32 %v1008_v2 }
 0xcad   :  { %v2136_v5 = vpop.eup %2135  ;;  %v1026_v6 = vpop.permute.xlu1 %1025 }
 0xcae   :  { %v2561_v7 = vadd.f32 %v1026_v6, %v1018_v3  ;;  %1011 = vrot.lane.b32.xlu0 %v2136_v5, %s2239_s1 }
 0xcb0   :  { %2137 = vtanh.f32 %v2561_v7 }
 0xcbd   :  { %v2138_v9 = vpop.eup %2137 }
 0xcbe   :  { %1031 = vrot.lane.b32.xlu1 %v2138_v9, %s2239_s1 }
 0xd20   :  { %v1012_v14 = vpop.permute.xlu0 %1011 }
 0xd21   :  { %v1014_v8 = vmul.f32 %v1012_v14, %v997_v59 }
 0xd23   :  { %1036 = vrot.lane.b32.xlu0 %v1014_v8, %s2241_s3 }
 0xd30   :  { %v1032_v24 = vpop.permute.xlu1 %1031 }
 0xd31   :  { %v1034_v25 = vmul.f32 %v1032_v24, %v1017_v61 }
 0xd33   :  { %1112 = vrot.lane.b32.xlu1 %v1034_v25, %s2241_s3 }
 0xd95   :  { %v1037_v26 = vpop.permute.xlu0 %1036 }
 0xd96   :  { %1917 = vmatmul.mubr.msk.f32.vlgmr.msra.gmra.mxu0 %vm249_vm1, %v1037_v26 }
 0xd97   :  { %1261 = vmatpush1.msra.mxu0 %v2327_v16  ;;  %1300 = vmatprep.mubr.f32.mxu0 %v2240_v19 }
 0xd98   :  { %1262 = vmatprep.subr.mxu0 %v2332_v17 }
 0xd99   :  { %1263 = vmatpush1.msra.mxu0 %v2338_v18 }
 0xd9a   :  { %1264 = vmatprep.subr.mxu0 %v2345_v20 }
 0xd9b   :  { %1265 = vmatpush1.msra.mxu0 %v2352_v21 }
 0xd9c   :  { %1266 = vmatprep.subr.mxu0 %v2359_v22 }
 0xd9d   :  { %1267 = vmatpush1.msra.mxu0 %v2366_v23 }
 0xd9e   :  { %1456 = vmatprep.subr.mxu0 %v2322_v15 }
 0xda5   :  { %v1113_v28 = vpop.permute.xlu1 %1112 }
 0xda6   :  { %2048 = vmatmul.mubr.msk.f32.vlgmr.msra.gmra.mxu1 %vm249_vm1, %v1113_v28 }
 0xda7   :  { %2051 = vmatpush3.msra.mxu1 %v2380_v27  ;;  %2058 = vmatprep.mubr.msk.f32.mxu1 %vm2242_vm2, %v2240_v19 }
 0xda8   :  { %2052 = vmatprep.subr.mxu1 %v2240_v19 }
 0xda9   :  { %2053 = vmatpush3.msra.mxu1 %v2383_v29 }
 0xdaa   :  { %2054 = vmatprep.subr.mxu1 %v2240_v19 }
 0xdab   :  { %2055 = vmatpush3.msra.mxu1 %v2389_v30 }
 0xdac   :  { %2056 = vmatprep.subr.mxu1 %v2240_v19 }
 0xdad   :  { %2057 = vmatpush3.msra.mxu1 %v2393_v31 }
 0xdae   :  { %2061 = vmatprep.subr.mxu1 %v2240_v19 }
 0xe56   :  { %v1106_v33 = vpop.f32.mrf.mxu0 }
 0xe57   :  { %v1188_v34 = vadd.f32 %v1106_v33, %v191_v32 }
 0xe58   :  { %v1108_v37 = vpop.f32.mrf.mxu0 }
 0xe59   :  { %2139 = vtanh.f32 %v1188_v34 }
 0xe66   :  { %v2140_v35 = vpop.eup %2139  ;;  %v1182_v38 = vpop.f32.mrf.mxu1 }
 0xe67   :  { %v1189_v39 = vadd.f32 %v1182_v38, %v1108_v37  ;;  %1196 = vrot.lane.b32.xlu0 %v2140_v35, %s2239_s1  ;;  %v1192_v43 = vmul.f32 0.5, %v2140_v35 }
 0xe68   :  { %v2049_v40 = vpop.f32.mrf.mxu1 }
 0xe69   :  { %v1190_v41 = vadd.f32 %v2415_v36, %v1189_v39  ;;  %v1193_v44 = vadd.f32 0.5, %v1192_v43 }
 0xe6b   :  { %2141 = vtanh.f32 %v1190_v41  ;;  %v1194_v50 = vmul.f32 %v1193_v44, %v1008_v2 }
 0xe78   :  { %v2142_v42 = vpop.eup %2141 }
 0xe79   :  { %1216 = vrot.lane.b32.xlu1 %v2142_v42, %s2239_s1  ;;  %v1212_v46 = vmul.f32 0.5, %v2142_v42 }
 0xe7b   :  { %v1213_v47 = vadd.f32 0.5, %v1212_v46 }
 0xe7d   :  { %v1214_v55 = vmul.f32 %v1213_v47, %v2561_v7 }
 0xed9   :  { %v1197_v45 = vpop.permute.xlu0 %1196 }
 0xeda   :  { %v1199_v10 = vmul.f32 %v1197_v45, %v1193_v44 }
 0xedc   :  { %1201 = vrot.lane.b32.xlu0 %v1199_v10, %s2239_s1 }
 0xeeb   :  { %v1217_v48 = vpop.permute.xlu1 %1216 }
 0xeec   :  { %v1219_v49 = vmul.f32 %v1217_v48, %v1213_v47 }
 0xeee   :  { %1221 = vrot.lane.b32.xlu1 %v1219_v49, %s2239_s1 }
 0xf4e   :  { %v1202_v51 = vpop.permute.xlu0 %1201 }
 0xf4f   :  { %v1204_v52 = vadd.f32 %v1202_v51, %v1194_v50 }
 0xf51   :  { %2143 = vtanh.f32 %v1204_v52 }
 0xf5e   :  { %v2144_v54 = vpop.eup %2143 }
 0xf5f   :  { %1207 = vrot.lane.b32.xlu0 %v2144_v54, %s2239_s1 }
 0xf60   :  { %v1222_v57 = vpop.permute.xlu1 %1221 }
 0xf61   :  { %v1224_v58 = vadd.f32 %v1222_v57, %v1214_v55 }
 0xf63   :  { %2145 = vtanh.f32 %v1224_v58 }
 0xf70   :  { %v2146_v53 = vpop.eup %2145 }
 0xf71   :  { %1227 = vrot.lane.b32.xlu1 %v2146_v53, %s2239_s1 }
 0xfd1   :  { %v1208_v59 = vpop.permute.xlu0 %1207 }
 0xfd2   :  { %v1210_v56 = vmul.f32 %v1208_v59, %v1193_v44 }
 0xfd4   :  { %1232 = vrot.lane.b32.xlu0 %v1210_v56, %s2241_s3 }
 0xfe3   :  { %v1228_v11 = vpop.permute.xlu1 %1227 }
 0xfe4   :  { %v1230_v60 = vmul.f32 %v1228_v11, %v1213_v47 }
 0xfe6   :  { %1308 = vrot.lane.b32.xlu1 %v1230_v60, %s2241_s3 }
0x1046   :  { %v1233_v61 = vpop.permute.xlu0 %1232 }
0x1047   :  { %1919 = vmatmul.mubr.msk.f32.vlgmr.msra.gmra.mxu0 %vm249_vm1, %v1233_v61 }
0x1048   :  { %1457 = vmatpush1.msra.mxu0 %v2327_v16  ;;  %1496 = vmatprep.mubr.f32.mxu0 %v2240_v19 }
0x1049   :  { %1458 = vmatprep.subr.mxu0 %v2332_v17 }
0x104a   :  { %1459 = vmatpush1.msra.mxu0 %v2338_v18 }
0x104b   :  { %1460 = vmatprep.subr.mxu0 %v2345_v20 }
0x104c   :  { %1461 = vmatpush1.msra.mxu0 %v2352_v21 }
0x104d   :  { %1462 = vmatprep.subr.mxu0 %v2359_v22 }
0x104e   :  { %1463 = vmatpush1.msra.mxu0 %v2366_v23 }
0x104f   :  { %1652 = vmatprep.subr.mxu0 %v2322_v15  ;;  %v196_v15 = vadd.f32 %v2311_v4, %v2487_v13 }
0x1058   :  { %v1309_v62 = vpop.permute.xlu1 %1308 }
0x1059   :  { %2059 = vmatmul.mubr.msk.f32.vlgmr.msra.gmra.mxu1 %vm249_vm1, %v1309_v62 }
0x105a   :  { %2062 = vmatpush3.msra.mxu1 %v2380_v27  ;;  %2069 = vmatprep.mubr.msk.f32.mxu1 %vm2242_vm2, %v2240_v19 }
0x105b   :  { %2063 = vmatprep.subr.mxu1 %v2240_v19 }
0x105c   :  { %2064 = vmatpush3.msra.mxu1 %v2383_v29 }
0x105d   :  { %2065 = vmatprep.subr.mxu1 %v2240_v19 }
0x105e   :  { %2066 = vmatpush3.msra.mxu1 %v2389_v30 }
0x105f   :  { %2067 = vmatprep.subr.mxu1 %v2240_v19 }
0x1060   :  { %2068 = vmatpush3.msra.mxu1 %v2393_v31 }
0x1061   :  { %2072 = vmatprep.subr.mxu1 %v2240_v19 }
0x1107   :  { %v1302_v63 = vpop.f32.mrf.mxu0 }
0x1108   :  { %v1384_v0 = vadd.f32 %v1302_v63, %v196_v15 }
0x1109   :  { %v1304_v2 = vpop.f32.mrf.mxu0 }
0x110a   :  { %2147 = vtanh.f32 %v1384_v0 }
0x1117   :  { %v2148_v1 = vpop.eup %2147 }
0x1118   :  { %1392 = vrot.lane.b32.xlu0 %v2148_v1, %s2239_s1  ;;  %v1388_v14 = vmul.f32 0.5, %v2148_v1 }
0x1119   :  { %v1378_v3 = vpop.f32.mrf.mxu1 }
0x111a   :  { %v1385_v5 = vadd.f32 %v1378_v3, %v1304_v2  ;;  %v1389_v8 = vadd.f32 0.5, %v1388_v14 }
0x111b   :  { %v2060_v6 = vpop.f32.mrf.mxu1 }
0x111c   :  { %v1386_v7 = vadd.f32 %v2415_v36, %v1385_v5  ;;  %v1390_v33 = vmul.f32 %v1389_v8, %v1204_v52 }
0x111e   :  { %2149 = vtanh.f32 %v1386_v7 }
0x112b   :  { %v2150_v9 = vpop.eup %2149 }
0x112c   :  { %1412 = vrot.lane.b32.xlu1 %v2150_v9, %s2239_s1  ;;  %v1408_v25 = vmul.f32 0.5, %v2150_v9 }
0x112e   :  { %v1409_v26 = vadd.f32 0.5, %v1408_v25 }
0x1130   :  { %v1410_v38 = vmul.f32 %v1409_v26, %v1224_v58 }
0x118a   :  { %v1393_v24 = vpop.permute.xlu0 %1392 }
0x118b   :  { %v1395_v13 = vmul.f32 %v1393_v24, %v1389_v8 }
0x118d   :  { %1397 = vrot.lane.b32.xlu0 %v1395_v13, %s2239_s1 }
0x119e   :  { %v1413_v28 = vpop.permute.xlu1 %1412 }
0x119f   :  { %v1415_v32 = vmul.f32 %v1413_v28, %v1409_v26  ;;  %v1798_v28 = vld [vmem:[#allocation6 + $0x18] sm:$0xff] }
0x11a1   :  { %1417 = vrot.lane.b32.xlu1 %v1415_v32, %s2239_s1  ;;  %v1797_v32 = vld [vmem:[#allocation6 + $0x10] sm:$0xff] }
0x11ff   :  { %v1398_v34 = vpop.permute.xlu0 %1397 }
0x1200   :  { %v1400_v35 = vadd.f32 %v1398_v34, %v1390_v33  ;;  %v1795_v33 = vld [vmem:[#allocation6] sm:$0xff] }
0x1202   :  { %2151 = vtanh.f32 %v1400_v35 }
0x120f   :  { %v2152_v37 = vpop.eup %2151 }
0x1210   :  { %1403 = vrot.lane.b32.xlu0 %v2152_v37, %s2239_s1 }
0x1213   :  { %v1418_v39 = vpop.permute.xlu1 %1417 }
0x1214   :  { %v1420_v40 = vadd.f32 %v1418_v39, %v1410_v38  ;;  %v1925_v39 = vld [vmem:[%s2690_s7] ss:$0 sm:$0xff] }
0x1216   :  { %2153 = vtanh.f32 %v1420_v40 }
0x1223   :  { %v2154_v41 = vpop.eup %2153 }
0x1224   :  { %1423 = vrot.lane.b32.xlu1 %v2154_v41, %s2239_s1 }
0x1282   :  { %v1404_v42 = vpop.permute.xlu0 %1403 }
0x1283   :  { %v1406_v43 = vmul.f32 %v1404_v42, %v1389_v8 }
0x1285   :  { %1428 = vrot.lane.b32.xlu0 %v1406_v43, %s2241_s3 }
0x1296   :  { %v1424_v44 = vpop.permute.xlu1 %1423 }
0x1297   :  { %v1426_v45 = vmul.f32 %v1424_v44, %v1409_v26 }
0x1299   :  { %1504 = vrot.lane.b32.xlu1 %v1426_v45, %s2241_s3 }
0x12f7   :  { %v1429_v10 = vpop.permute.xlu0 %1428 }
0x12f8   :  { %1921 = vmatmul.mubr.msk.f32.vlgmr.msra.gmra.mxu0 %vm249_vm1, %v1429_v10 }
0x12f9   :  { %1653 = vmatpush1.msra.mxu0 %v2327_v16  ;;  %1692 = vmatprep.mubr.f32.mxu0 %v2240_v19  ;;  %v201_v16 = vadd.f32 %v2485_v12, %v2311_v4 }
0x12fa   :  { %1654 = vmatprep.subr.mxu0 %v2332_v17 }
0x12fb   :  { %1655 = vmatpush1.msra.mxu0 %v2338_v18 }
0x12fc   :  { %1656 = vmatprep.subr.mxu0 %v2345_v20 }
0x12fd   :  { %1657 = vmatpush1.msra.mxu0 %v2352_v21 }
0x12fe   :  { %1658 = vmatprep.subr.mxu0 %v2359_v22 }
0x12ff   :  { %1659 = vmatpush1.msra.mxu0 %v2366_v23 }
0x1300   :  { %2083 = vmatprep.subr.mxu0 %v2240_v19 }
0x130b   :  { %v1505_v46 = vpop.permute.xlu1 %1504 }
0x130c   :  { %2070 = vmatmul.mubr.msk.f32.vlgmr.msra.gmra.mxu1 %vm249_vm1, %v1505_v46 }
0x130d   :  { %2073 = vmatpush3.msra.mxu1 %v2380_v27  ;;  %2080 = vmatprep.mubr.msk.f32.mxu1 %vm2242_vm2, %v2240_v19 }
0x130e   :  { %2074 = vmatprep.subr.mxu1 %v2240_v19 }
0x130f   :  { %2075 = vmatpush3.msra.mxu1 %v2383_v29 }
0x1310   :  { %2076 = vmatprep.subr.mxu1 %v2240_v19 }
0x1311   :  { %2077 = vmatpush3.msra.mxu1 %v2389_v30 }
0x1312   :  { %2078 = vmatprep.subr.mxu1 %v2240_v19 }
0x1313   :  { %2079 = vmatpush3.msra.mxu1 %v2393_v31 }
0x13b8   :  { %v1498_v17 = vpop.f32.mrf.mxu0 }
0x13b9   :  { %v1580_v18 = vadd.f32 %v1498_v17, %v201_v16 }
0x13ba   :  { %v1500_v21 = vpop.f32.mrf.mxu0 }
0x13bb   :  { %2155 = vtanh.f32 %v1580_v18 }
0x13c8   :  { %v2156_v20 = vpop.eup %2155 }
0x13c9   :  { %1588 = vrot.lane.b32.xlu0 %v2156_v20, %s2239_s1  ;;  %v1584_v31 = vmul.f32 0.5, %v2156_v20 }
0x13cb   :  { %v1585_v47 = vadd.f32 0.5, %v1584_v31 }
0x13cc   :  { %v1574_v22 = vpop.f32.mrf.mxu1 }
0x13cd   :  { %v1581_v23 = vadd.f32 %v1574_v22, %v1500_v21  ;;  %v1586_v52 = vmul.f32 %v1585_v47, %v1400_v35 }
0x13ce   :  { %v2071_v27 = vpop.f32.mrf.mxu1 }
0x13cf   :  { %v1582_v29 = vadd.f32 %v2415_v36, %v1581_v23 }
0x13d1   :  { %2157 = vtanh.f32 %v1582_v29 }
0x13de   :  { %v2158_v30 = vpop.eup %2157 }
0x13df   :  { %1608 = vrot.lane.b32.xlu1 %v2158_v30, %s2239_s1  ;;  %v1604_v12 = vmul.f32 0.5, %v2158_v30 }
0x13e1   :  { %v1605_v49 = vadd.f32 0.5, %v1604_v12 }
0x13e3   :  { %v1606_v58 = vmul.f32 %v1605_v49, %v1420_v40 }
0x143b   :  { %v1589_v48 = vpop.permute.xlu0 %1588 }
0x143c   :  { %v1591_v4 = vmul.f32 %v1589_v48, %v1585_v47 }
0x143e   :  { %1593 = vrot.lane.b32.xlu0 %v1591_v4, %s2239_s1 }
0x1451   :  { %v1609_v50 = vpop.permute.xlu1 %1608 }
0x1452   :  { %v1611_v51 = vmul.f32 %v1609_v50, %v1605_v49 }
0x1454   :  { %1613 = vrot.lane.b32.xlu1 %v1611_v51, %s2239_s1 }
0x14b0   :  { %v1594_v54 = vpop.permute.xlu0 %1593 }
0x14b1   :  { %v1596_v55 = vadd.f32 %v1594_v54, %v1586_v52 }
0x14b3   :  { %2159 = vtanh.f32 %v1596_v55 }
0x14c0   :  { %v2160_v57 = vpop.eup %2159 }
0x14c1   :  { %1599 = vrot.lane.b32.xlu0 %v2160_v57, %s2239_s1 }
0x14c6   :  { %v1614_v53 = vpop.permute.xlu1 %1613 }
0x14c7   :  { %v1616_v59 = vadd.f32 %v1614_v53, %v1606_v58 }
0x14c9   :  { %2161 = vtanh.f32 %v1616_v59 }
0x14d6   :  { %v2162_v56 = vpop.eup %2161 }
0x14d7   :  { %1619 = vrot.lane.b32.xlu1 %v2162_v56, %s2239_s1 }
0x1533   :  { %v1600_v11 = vpop.permute.xlu0 %1599 }
0x1534   :  { %v1602_v60 = vmul.f32 %v1600_v11, %v1585_v47 }
0x1536   :  { %1624 = vrot.lane.b32.xlu0 %v1602_v60, %s2241_s3 }
0x1549   :  { %v1620_v61 = vpop.permute.xlu1 %1619 }
0x154a   :  { %v1622_v62 = vmul.f32 %v1620_v61, %v1605_v49 }
0x154c   :  { %1699 = vrot.lane.b32.xlu1 %v1622_v62, %s2241_s3 }
0x15a8   :  { %v1625_v15 = vpop.permute.xlu0 %1624 }
0x15a9   :  { %1923 = vmatmul.mubr.msk.f32.vlgmr.msra.gmra.mxu0 %vm249_vm1, %v1625_v15 }
0x15aa   :  { %2091 = vmatprep.mubr.msk.f32.mxu0 %vm2242_vm2, %v2240_v19  ;;  %2084 = vmatpush3.msra.mxu0 %v1798_v28 }
0x15ab   :  { %2085 = vmatprep.subr.mxu0 %v2240_v19 }
0x15ac   :  { %2086 = vmatpush3.msra.mxu0 %v1797_v32 }
0x15ad   :  { %2087 = vmatprep.subr.mxu0 %v2240_v19 }
0x15be   :  { %v1700_v63 = vpop.permute.xlu1 %1699 }
0x15bf   :  { %2081 = vmatmul.mubr.msk.f32.vlgmr.msra.gmra.mxu1 %vm249_vm1, %v1700_v63 }
0x1669   :  { %v1694_v0 = vpop.f32.mrf.mxu0 }
0x166b   :  { %v1695_v1 = vpop.f32.mrf.mxu0 }
0x167f   :  { %v1769_v2 = vpop.f32.mrf.mxu1 }
0x1680   :  { %v1773_v3 = vadd.f32 %v1769_v2, %v1695_v1 }
0x1681   :  { %v2082_v5 = vpop.f32.mrf.mxu1 }
0x1682   :  { %v1774_v6 = vadd.f32 %v2415_v36, %v1773_v3  ;;  %v1796_v36 = vld [vmem:[#allocation6 + $0x8] sm:$0xff] }
0x1683   :  { %2088 = vmatpush3.msra.mxu0 %v1796_v36 }
0x1684   :  { %2163 = vtanh.f32 %v1774_v6  ;;  %2089 = vmatprep.subr.mxu0 %v2240_v19 }
0x1685   :  { %2090 = vmatpush3.msra.mxu0 %v1795_v33 }
0x1691   :  { %v2164_v7 = vpop.eup %2163 }
0x1692   :  { %1780 = vrot.lane.b32.xlu0 %v2164_v7, %s2239_s1  ;;  %v1776_v9 = vmul.f32 0.5, %v2164_v7 }
0x1694   :  { %v1777_v14 = vadd.f32 0.5, %v1776_v9 }
0x1696   :  { %v1778_v13 = vmul.f32 %v1777_v14, %v1616_v59 }
0x1704   :  { %v1781_v8 = vpop.permute.xlu0 %1780 }
0x1705   :  { %v1783_v24 = vmul.f32 %v1781_v8, %v1777_v14 }
0x1707   :  { %1785 = vrot.lane.b32.xlu1 %v1783_v24, %s2239_s1 }
0x1779   :  { %v1786_v25 = vpop.permute.xlu1 %1785 }
0x177a   :  { %v1788_v26 = vadd.f32 %v1786_v25, %v1778_v13 }
0x177c   :  { %2165 = vtanh.f32 %v1788_v26 }
0x1789   :  { %v2166_v34 = vpop.eup %2165 }
0x178a   :  { %1791 = vrot.lane.b32.xlu0 %v2166_v34, %s2239_s1  ;;  %s2209_s1 = scalar_lea.vmem %s1891_s28, 128 }
0x178b   :  { %p2210_p10 = scmp.ne.s32.totalorder %s1891_s28, %s2209_s1  ;;  %p2215_p12 = scmp.lt.s32.totalorder %s2209_s1, %s2209_s1 }
0x178d   :  { %p2216_p13 = por %p2215_p12, %p2214_p11 }
0x178f   :  { %p2217_p0 = pnand %p2216_p13, %p2210_p10 }
0x17fc   :  { %v1792_v35 = vpop.permute.xlu0 %1791 }
0x17fd   :  { %v1794_v37 = vmul.f32 %v1792_v35, %v1777_v14 }
0x17ff   :  { %1807 = vrot.lane.b32.xlu1 %v1794_v37, %s2241_s3 }
0x1871   :  { %v1808_v38 = vpop.permute.xlu1 %1807 }
0x1872   :  { %2092 = vmatmul.mubr.msk.f32.vlgmr.msra.gmra.mxu0 %vm249_vm1, %v1808_v38 }
0x1932   :  { %v1877_v40 = vpop.f32.mrf.mxu0 }
0x1933   :  { %v1878_v41 = vadd.f32 %v1925_v39, %v1877_v40 }
0x1934   :  { %v2093_v42 = vpop.f32.mrf.mxu0 }
0x1935   :  { %2167 = vtanh.f32 %v1878_v41 }
0x1942   :  { %v2168_v19 = vpop.eup %2167 }
0x1943   :  { %v1882_v43 = vmul.f32 3.14, %v2168_v19 }
0x1945   :  { %1883 = vst [vmem:[#allocation8] sm:$0xff] %v1882_v43 }
0x1946   :  { %2220 = shalt.err (!%p2217_p0)
}
0x1947   :  { %1893 = dma.vmem_to_hbm [thread:$0]  %s1891_s28, 128, %s2691_s8, [#allocation5]  }
0x1948   :  { %2233 = dma.done.wait [#allocation5], 128  }
0x1949   :  { %2234 = vsyncadd [#allocation5], 4294967168 }
0x194a   :  { %1897 = vsyncpa [#allocation4], 1 }
0x194b   :  { %1898 = vsyncpa [#allocation7], 1 }
0x194c   :  { %1899 = vsyncpa [#allocation5], 1 }

</bundles_post_ra>
